<compile_context>
chip_gen: v6e
topology: v6e:2x2x1
jax: 0.10.0
libtpu: 0.0.40
codegen_flags: <defaults>
</compile_context>

<pallas_src>
import jax
import jax.numpy as jnp
from jax import lax
from jax.experimental import pallas as pl
from jax.experimental.pallas import tpu as pltpu

# ----------------------------- config --------------------------------------
VOCAB = 100
HIDDEN = 32            # mini "bert hidden_size" (real BERT: 768)
N_LAYERS = 2
N_HEADS = 2
HEAD_DIM = HIDDEN // N_HEADS
INTERMEDIATE = 64
MAX_POS = 16
EMBED_DIM = 16         # TextEncoder embed_dim -> projection: H -> 2E -> E
BERT_LN_EPS = 1e-12
LN_EPS = 1e-5
BN_EPS = 1e-5
ATTN_SCALE = 1.0 / (HEAD_DIM ** 0.5)

VMEM_SPEC = pl.BlockSpec(memory_space=pltpu.MemorySpace.VMEM)

# ---------------------- packed-parameter slab layout -----------------------
# One (SLAB_ROWS, 128) f32 slab; each row holds one small vector (lane 0..w).
R_EMB_LN_G, R_EMB_LN_B = 0, 1
LAYER_ROW_BASE = 2
LR_BQ = 0                       # + head  (N_HEADS rows, width HEAD_DIM)
LR_BK = LR_BQ + N_HEADS
LR_BV = LR_BK + N_HEADS
LR_BO = LR_BV + N_HEADS         # width HIDDEN
LR_LN1_G, LR_LN1_B = LR_BO + 1, LR_BO + 2
LR_BI, LR_BFF = LR_BO + 3, LR_BO + 4
LR_LN2_G, LR_LN2_B = LR_BO + 5, LR_BO + 6
ROWS_PER_LAYER = LR_LN2_B + 1                              # 13
PROJ_ROW_BASE = LAYER_ROW_BASE + N_LAYERS * ROWS_PER_LAYER  # 28
R_B1 = PROJ_ROW_BASE + 0
R_BN_G = PROJ_ROW_BASE + 1
R_BN_B = PROJ_ROW_BASE + 2
R_BN_M = PROJ_ROW_BASE + 3
R_BN_V = PROJ_ROW_BASE + 4
R_B2 = PROJ_ROW_BASE + 5
R_PLN_G = PROJ_ROW_BASE + 6
R_PLN_B = PROJ_ROW_BASE + 7
N_SLAB_ROWS = PROJ_ROW_BASE + 8                             # 36
SLAB_ROWS = ((N_SLAB_ROWS + 7) // 8) * 8                    # 40 (sublane mult)


# ----------------------------- kernel --------------------------------------
def _layer_norm(x, g, b, eps):
    mu = jnp.mean(x, axis=-1, keepdims=True)
    var = jnp.mean((x - mu) ** 2, axis=-1, keepdims=True)
    return (x - mu) * lax.rsqrt(var + eps) * g + b


def fused_text_encoder_kernel(
    ids_ref,        # (B*S, 1) int32
    bias_ref,       # (B, S)   f32   additive attention bias
    slab_ref,       # (SLAB_ROWS, 128) f32  packed biases/LN/BN params
    word_emb_ref,   # (VOCAB, H) f32
    pos_type_ref,   # (MAX_POS, H) f32  (position + token-type-0 embeddings)
    wqkv_ref,       # (N_LAYERS*3*N_HEADS, H, HEAD_DIM) bf16
    wo_ref,         # (N_LAYERS*N_HEADS, HEAD_DIM, H)   bf16
    wi_ref,         # (N_LAYERS, H, INTERMEDIATE)       bf16
    wff_ref,        # (N_LAYERS, INTERMEDIATE, H)       bf16
    w1_ref,         # (H, 2E) f32
    w2_ref,         # (2E, E) f32
    o_ref,          # (B, E)  f32
):
    B, S = bias_ref.shape
    BS = B * S

    slab = slab_ref[...]

    def prow(r, w):               # one packed (1, w) parameter row
        return slab[r:r + 1, :w]

    # ---- embeddings: one-hot gather on the MXU + broadcast pos/type + LN ----
    ids = ids_ref[...]                                        # [BS, 1] int32
    vocab_iota = lax.broadcasted_iota(jnp.int32, (BS, VOCAB), 1)
    one_hot = (ids == vocab_iota).astype(jnp.float32)         # [BS, VOCAB]
    # TODO(synk): one-hot gather only sane for tiny VOCAB; real vocab needs a
    #   scalar-prefetch / DMA row gather from an HBM-resident table.
    we = jnp.dot(one_hot, word_emb_ref[...],
                 preferred_element_type=jnp.float32)          # [BS, H]
    pt = pos_type_ref[0:S, :]                                 # [S, H]
    x = (we.reshape(B, S, HIDDEN) + pt[None]).reshape(BS, HIDDEN)
    x = _layer_norm(x, prow(R_EMB_LN_G, HIDDEN), prow(R_EMB_LN_B, HIDDEN),
                    BERT_LN_EPS)

    bias = bias_ref[...]                                      # [B, S]
    # TODO(synk): a fully-masked row (all keys masked) would still produce a
    #   0/0 softmax; not reachable with the test inputs.

    # ---- transformer layers (static Python loop, fully unrolled) ----
    for l in range(N_LAYERS):
        base = LAYER_ROW_BASE + l * ROWS_PER_LAYER
        x_bf = x.astype(jnp.bfloat16)

        # Per-head, lane-0-aligned q/k/v projections (no lane slicing).
        q_heads, k_heads, v_heads = [], [], []
        for h in range(N_HEADS):
            wq = wqkv_ref[(l * 3 + 0) * N_HEADS + h]          # [H, dh] bf16
            wk = wqkv_ref[(l * 3 + 1) * N_HEADS + h]
            wv = wqkv_ref[(l * 3 + 2) * N_HEADS + h]
            q_h = jnp.dot(x_bf, wq, preferred_element_type=jnp.float32)
            q_h = (q_h + prow(base + LR_BQ + h, HEAD_DIM)) * ATTN_SCALE
            k_h = jnp.dot(x_bf, wk, preferred_element_type=jnp.float32)
            k_h = k_h + prow(base + LR_BK + h, HEAD_DIM)
            v_h = jnp.dot(x_bf, wv, preferred_element_type=jnp.float32)
            v_h = v_h + prow(base + LR_BV + h, HEAD_DIM)
            q_heads.append(q_h.astype(jnp.bfloat16))
            k_heads.append(k_h.astype(jnp.bfloat16))
            v_heads.append(v_h.astype(jnp.bfloat16))

        # Attention per (batch, head); MXU dots are tiny/underfilled at this
        # toy size (accepted — latency-bound, not throughput-bound).
        attn_rows = []
        for b in range(B):
            bias_b = bias[b:b + 1, :]                         # [1, S]
            r0 = b * S                                        # sublane-aligned
            acc_b = None
            for h in range(N_HEADS):
                q_bh = q_heads[h][r0:r0 + S, :]               # [S, dh]
                k_bh = k_heads[h][r0:r0 + S, :]
                v_bh = v_heads[h][r0:r0 + S, :]
                # q @ k^T without an explicit transpose (contract last dims)
                s = lax.dot_general(q_bh, k_bh, (((1,), (1,)), ((), ())),
                                    preferred_element_type=jnp.float32)
                s = s + bias_b                                # [S, S]
                m = jnp.max(s, axis=-1, keepdims=True)
                p = jnp.exp(s - m)
                denom = jnp.sum(p, axis=-1, keepdims=True)
                ctx = jnp.dot(p.astype(jnp.bfloat16), v_bh,
                              preferred_element_type=jnp.float32)
                ctx = ctx * pl.reciprocal(denom, approx=True)  # EUP slot
                contrib = jnp.dot(ctx.astype(jnp.bfloat16),
                                  wo_ref[l * N_HEADS + h],     # [dh, H]
                                  preferred_element_type=jnp.float32)
                acc_b = contrib if acc_b is None else acc_b + contrib
            attn_rows.append(acc_b)                           # [S, H]
        attn = jnp.concatenate(attn_rows, axis=0)             # [BS, H]
        attn = attn + prow(base + LR_BO, HIDDEN)
        x = _layer_norm(attn + x, prow(base + LR_LN1_G, HIDDEN),
                        prow(base + LR_LN1_B, HIDDEN), BERT_LN_EPS)

        # TODO(synk): HF BERT uses exact erf-GELU; tanh-approximate GELU here
        #   (matches the in-script reference).
        hmid = jnp.dot(x.astype(jnp.bfloat16), wi_ref[l],
                       preferred_element_type=jnp.float32)
        hmid = jax.nn.gelu(hmid + prow(base + LR_BI, INTERMEDIATE),
                           approximate=True)
        ff = jnp.dot(hmid.astype(jnp.bfloat16), wff_ref[l],
                     preferred_element_type=jnp.float32)
        ff = ff + prow(base + LR_BFF, HIDDEN)
        x = _layer_norm(ff + x, prow(base + LR_LN2_G, HIDDEN),
                        prow(base + LR_LN2_B, HIDDEN), BERT_LN_EPS)

    # ---- CLS token (sublane-0 pick, no concat) + projection head (f32) ----
    cls = x.reshape(B, S, HIDDEN)[:, 0, :]                    # [B, H]
    hp = jnp.dot(cls, w1_ref[...],
                 preferred_element_type=jnp.float32) + prow(R_B1, 2 * EMBED_DIM)
    # BatchNorm1d in eval mode (running stats); Dropout is identity in eval.
    # TODO(synk): training-mode batch statistics / dropout sampling not modeled.
    hp = (hp - prow(R_BN_M, 2 * EMBED_DIM)) * lax.rsqrt(
        prow(R_BN_V, 2 * EMBED_DIM) + BN_EPS)
    hp = hp * prow(R_BN_G, 2 * EMBED_DIM) + prow(R_BN_B, 2 * EMBED_DIM)
    hp = jnp.maximum(hp, 0.0)
    y = jnp.dot(hp, w2_ref[...],
                preferred_element_type=jnp.float32) + prow(R_B2, EMBED_DIM)
    o_ref[...] = _layer_norm(y, prow(R_PLN_G, EMBED_DIM),
                             prow(R_PLN_B, EMBED_DIM), LN_EPS)


# ----------------------------- packing (runs once) --------------------------
def pack_params(params):
    """One-time repack of params into DMA-friendly slabs / aligned weights."""
    dh = HEAD_DIM
    slab = jnp.zeros((SLAB_ROWS, 128), jnp.float32)

    def put(s, row, vec):
        vec = jnp.asarray(vec, jnp.float32).reshape(-1)
        return s.at[row, :vec.shape[0]].set(vec)

    slab = put(slab, R_EMB_LN_G, params["emb_ln_g"])
    slab = put(slab, R_EMB_LN_B, params["emb_ln_b"])
    for l in range(N_LAYERS):
        base = LAYER_ROW_BASE + l * ROWS_PER_LAYER
        bqkv = params["bqkv"][l].reshape(3, N_HEADS, dh)
        for h in range(N_HEADS):
            slab = put(slab, base + LR_BQ + h, bqkv[0, h])
            slab = put(slab, base + LR_BK + h, bqkv[1, h])
            slab = put(slab, base + LR_BV + h, bqkv[2, h])
        slab = put(slab, base + LR_BO, params["bo"][l])
        slab = put(slab, base + LR_LN1_G, params["ln1_g"][l])
        slab = put(slab, base + LR_LN1_B, params["ln1_b"][l])
        slab = put(slab, base + LR_BI, params["bi"][l])
        slab = put(slab, base + LR_BFF, params["bff"][l])
        slab = put(slab, base + LR_LN2_G, params["ln2_g"][l])
        slab = put(slab, base + LR_LN2_B, params["ln2_b"][l])
    slab = put(slab, R_B1, params["b1"])
    slab = put(slab, R_BN_G, params["bn_g"])
    slab = put(slab, R_BN_B, params["bn_b"])
    slab = put(slab, R_BN_M, params["bn_m"])
    slab = put(slab, R_BN_V, params["bn_v"])
    slab = put(slab, R_B2, params["b2"])
    slab = put(slab, R_PLN_G, params["pln_g"])
    slab = put(slab, R_PLN_B, params["pln_b"])

    # (H, 3H) columns are ordered (proj, head, head_dim) -> split per
    # (layer, proj, head) so every attention dot operand is lane-0 aligned.
    wqkv = params["wqkv"].reshape(N_LAYERS, HIDDEN, 3, N_HEADS, dh)
    wqkv = jnp.transpose(wqkv, (0, 2, 3, 1, 4))          # (L,3,nh,H,dh)
    wqkv = wqkv.reshape(N_LAYERS * 3 * N_HEADS, HIDDEN, dh).astype(jnp.bfloat16)
    wo = params["wo"].reshape(N_LAYERS * N_HEADS, dh, HIDDEN).astype(jnp.bfloat16)

    return {
        "slab": slab,
        "word_emb": params["word_emb"],                                 # f32
        "pos_type": params["pos_emb"] + params["type_emb"][0:1],        # f32
        "wqkv": wqkv,                                                   # bf16
        "wo": wo,                                                       # bf16
        "wi": params["wi"].astype(jnp.bfloat16),
        "wff": params["wff"].astype(jnp.bfloat16),
        "w1": params["w1"],                                             # f32
        "w2": params["w2"],                                             # f32
    }


# ----------------------------- wrapper -------------------------------------
@jax.jit
def text_encoder(packed, input_ids, attention_mask):
    B, S = input_ids.shape
    ids = input_ids.astype(jnp.int32).reshape(B * S, 1)
    # Additive attention bias, computed once and reused by every layer.
    mask_bias = (1.0 - attention_mask.astype(jnp.float32)) * (-1e9)     # [B, S]

    args = (
        ids, mask_bias, packed["slab"], packed["word_emb"], packed["pos_type"],
        packed["wqkv"], packed["wo"], packed["wi"], packed["wff"],
        packed["w1"], packed["w2"],
    )
    # TODO(synk): for real batch sizes add a "parallel" row/batch grid axis
    #   (dimension_semantics) so v7x's two TensorCores both get work.
    return pl.pallas_call(
        fused_text_encoder_kernel,
        out_shape=jax.ShapeDtypeStruct((B, EMBED_DIM), jnp.float32),
        in_specs=[VMEM_SPEC] * len(args),
        out_specs=VMEM_SPEC,
    )(*args)


# ----------------------------- parameters ----------------------------------
def init_params(key):
    def nrm(k, shape):
        return 0.02 * jax.random.normal(k, shape, jnp.float32)

    keys = iter(jax.random.split(key, 64))
    params = {
        "word_emb": nrm(next(keys), (VOCAB, HIDDEN)),
        "pos_emb": nrm(next(keys), (MAX_POS, HIDDEN)),
        "type_emb": nrm(next(keys), (2, HIDDEN)),
        "emb_ln_g": jnp.ones((1, HIDDEN), jnp.float32),
        "emb_ln_b": jnp.zeros((1, HIDDEN), jnp.float32),
        "wqkv": jnp.stack([nrm(next(keys), (HIDDEN, 3 * HIDDEN))
                           for _ in range(N_LAYERS)]),
        "bqkv": jnp.zeros((N_LAYERS, 1, 3 * HIDDEN), jnp.float32),
        "wo": jnp.stack([nrm(next(keys), (HIDDEN, HIDDEN))
                         for _ in range(N_LAYERS)]),
        "bo": jnp.zeros((N_LAYERS, 1, HIDDEN), jnp.float32),
        "ln1_g": jnp.ones((N_LAYERS, 1, HIDDEN), jnp.float32),
        "ln1_b": jnp.zeros((N_LAYERS, 1, HIDDEN), jnp.float32),
        "wi": jnp.stack([nrm(next(keys), (HIDDEN, INTERMEDIATE))
                         for _ in range(N_LAYERS)]),
        "bi": jnp.zeros((N_LAYERS, 1, INTERMEDIATE), jnp.float32),
        "wff": jnp.stack([nrm(next(keys), (INTERMEDIATE, HIDDEN))
                          for _ in range(N_LAYERS)]),
        "bff": jnp.zeros((N_LAYERS, 1, HIDDEN), jnp.float32),
        "ln2_g": jnp.ones((N_LAYERS, 1, HIDDEN), jnp.float32),
        "ln2_b": jnp.zeros((N_LAYERS, 1, HIDDEN), jnp.float32),
        "w1": nrm(next(keys), (HIDDEN, 2 * EMBED_DIM)),
        "b1": jnp.zeros((1, 2 * EMBED_DIM), jnp.float32),
        "bn_g": jnp.ones((1, 2 * EMBED_DIM), jnp.float32),
        "bn_b": jnp.zeros((1, 2 * EMBED_DIM), jnp.float32),
        "bn_m": jnp.zeros((1, 2 * EMBED_DIM), jnp.float32),
        "bn_v": jnp.ones((1, 2 * EMBED_DIM), jnp.float32),
        "w2": nrm(next(keys), (2 * EMBED_DIM, EMBED_DIM)),
        "b2": jnp.zeros((1, EMBED_DIM), jnp.float32),
        "pln_g": jnp.ones((1, EMBED_DIM), jnp.float32),
        "pln_b": jnp.zeros((1, EMBED_DIM), jnp.float32),
    }
    return params


# ----------------------------- pure-JAX reference ---------------------------
def reference_text_encoder(params, input_ids, attention_mask):
    B, S = input_ids.shape

    def ln(x, g, b, eps):
        mu = jnp.mean(x, -1, keepdims=True)
        var = jnp.mean((x - mu) ** 2, -1, keepdims=True)
        return (x - mu) / jnp.sqrt(var + eps) * g + b

    we = jnp.take(params["word_emb"], input_ids, axis=0)
    pe = params["pos_emb"][:S][None]
    te = params["type_emb"][0][None, None]
    x = (we + pe + te).reshape(B * S, HIDDEN)
    x = ln(x, params["emb_ln_g"], params["emb_ln_b"], BERT_LN_EPS)

    bias = (1.0 - attention_mask.astype(jnp.float32)) * (-1e9)
    for l in range(N_LAYERS):
        qkv = x @ params["wqkv"][l] + params["bqkv"][l]
        qkv = qkv.reshape(B, S, 3, N_HEADS, HEAD_DIM)
        q = qkv[:, :, 0].transpose(0, 2, 1, 3)
        k = qkv[:, :, 1].transpose(0, 2, 1, 3)
        v = qkv[:, :, 2].transpose(0, 2, 1, 3)
        s = jnp.einsum("bhqd,bhkd->bhqk", q, k) * ATTN_SCALE
        s = s + bias[:, None, None, :]
        p = jax.nn.softmax(s, axis=-1)
        ctx = jnp.einsum("bhqk,bhkd->bhqd", p, v)
        ctx = ctx.transpose(0, 2, 1, 3).reshape(B * S, HIDDEN)
        x = ln(ctx @ params["wo"][l] + params["bo"][l] + x,
               params["ln1_g"][l], params["ln1_b"][l], BERT_LN_EPS)
        h = jax.nn.gelu(x @ params["wi"][l] + params["bi"][l], approximate=True)
        x = ln(h @ params["wff"][l] + params["bff"][l] + x,
               params["ln2_g"][l], params["ln2_b"][l], BERT_LN_EPS)

    cls = x.reshape(B, S, HIDDEN)[:, 0, :]
    h = cls @ params["w1"] + params["b1"]
    h = (h - params["bn_m"]) / jnp.sqrt(params["bn_v"] + BN_EPS)
    h = h * params["bn_g"] + params["bn_b"]
    h = jnp.maximum(h, 0.0)
    y = h @ params["w2"] + params["b2"]
    return ln(y, params["pln_g"], params["pln_b"], LN_EPS)


# ----------------------------- main ----------------------------------------
if __name__ == "__main__":
    key = jax.random.PRNGKey(0)
    pkey, dkey = jax.random.split(key)
    params = init_params(pkey)
    packed = pack_params(params)          # one-time packing, outside the jit

    B, S = 2, 8
    input_ids = jax.random.randint(dkey, (B, S), 0, VOCAB, dtype=jnp.int32)
    attention_mask = jnp.ones((B, S), jnp.float32).at[1, 6:].set(0.0)

    out = text_encoder(packed, input_ids, attention_mask)
    out = jax.block_until_ready(out)
    assert out.shape == (B, EMBED_DIM) and out.dtype == jnp.float32
    assert bool(jnp.all(jnp.isfinite(out)))

    ref = reference_text_encoder(params, input_ids, attention_mask)
    max_err = float(jnp.max(jnp.abs(out - ref)))
    assert max_err < 1e-2, f"mismatch vs reference: max abs err {max_err}"

    print("KERNEL_OK")
</pallas_src>

<mosaic_0001>
module attributes {stable_mosaic.version = 11 : i64} {
  func.func @fused_text_encoder_kernel(%arg0: memref<16x1xi32, #tpu.memory_space<vmem>>, %arg1: memref<2x8xf32, #tpu.memory_space<vmem>>, %arg2: memref<40x128xf32, #tpu.memory_space<vmem>>, %arg3: memref<100x32xf32, #tpu.memory_space<vmem>>, %arg4: memref<16x32xf32, #tpu.memory_space<vmem>>, %arg5: memref<12x32x16xbf16, #tpu.memory_space<vmem>>, %arg6: memref<4x16x32xbf16, #tpu.memory_space<vmem>>, %arg7: memref<2x32x64xbf16, #tpu.memory_space<vmem>>, %arg8: memref<2x64x32xbf16, #tpu.memory_space<vmem>>, %arg9: memref<32x32xf32, #tpu.memory_space<vmem>>, %arg10: memref<32x16xf32, #tpu.memory_space<vmem>>, %arg11: memref<2x16xf32, #tpu.memory_space<vmem>>) attributes {dimension_semantics = [], scalar_prefetch = 0 : i64, scratch_operands = 0 : i64, tpu.core_type = #tpu.core_type<tc>} {
    %c0 = arith.constant 0 : index
    %c0_0 = arith.constant 0 : index
    %0 = vector.load %arg2[%c0, %c0_0] : memref<40x128xf32, #tpu.memory_space<vmem>>, vector<40x128xf32>
    %c0_1 = arith.constant 0 : index
    %c0_2 = arith.constant 0 : index
    %1 = vector.load %arg0[%c0_1, %c0_2] : memref<16x1xi32, #tpu.memory_space<vmem>>, vector<16x1xi32>
    %2 = tpu.iota {dimensions = array<i32: 1>} : vector<16x100xi32>
    %3 = vector.broadcast %1 : vector<16x1xi32> to vector<16x100xi32>
    %4 = arith.cmpi eq, %3, %2 : vector<16x100xi32>
    %5 = arith.extui %4 : vector<16x100xi1> to vector<16x100xi32>
    %6 = arith.sitofp %5 : vector<16x100xi32> to vector<16x100xf32>
    %c0_3 = arith.constant 0 : index
    %c0_4 = arith.constant 0 : index
    %7 = vector.load %arg3[%c0_3, %c0_4] : memref<100x32xf32, #tpu.memory_space<vmem>>, vector<100x32xf32>
    %cst = arith.constant dense<0.000000e+00> : vector<16x32xf32>
    %8 = tpu.matmul %6, %7, %cst {dimension_numbers = #tpu.dot_dimension_numbers<[1], [0], [0], [1], [0, 0, 1, 1], [], []>} : vector<16x100xf32>, vector<100x32xf32>, vector<16x32xf32> -> vector<16x32xf32>
    %c0_5 = arith.constant 0 : index
    %c0_6 = arith.constant 0 : index
    %9 = vector.load %arg4[%c0_5, %c0_6] : memref<16x32xf32, #tpu.memory_space<vmem>>, vector<8x32xf32>
    %10 = vector.shape_cast %8 : vector<16x32xf32> to vector<2x8x32xf32>
    %11 = vector.shape_cast %9 : vector<8x32xf32> to vector<1x8x32xf32>
    %12 = vector.broadcast %11 : vector<1x8x32xf32> to vector<2x8x32xf32>
    %13 = arith.addf %10, %12 : vector<2x8x32xf32>
    %14 = vector.shape_cast %13 : vector<2x8x32xf32> to vector<16x32xf32>
    %15 = vector.extract_strided_slice %0 {offsets = [0, 0], sizes = [1, 32], strides = [1, 1]} : vector<40x128xf32> to vector<1x32xf32>
    %16 = vector.extract_strided_slice %0 {offsets = [1, 0], sizes = [1, 32], strides = [1, 1]} : vector<40x128xf32> to vector<1x32xf32>
    %cst_7 = arith.constant dense<0.000000e+00> : vector<16xf32>
    %17 = vector.multi_reduction <add>, %14, %cst_7 [1] : vector<16x32xf32> to vector<16xf32>
    %18 = vector.shape_cast %17 : vector<16xf32> to vector<16x1xf32>
    %cst_8 = arith.constant 3.200000e+01 : f32
    %19 = vector.broadcast %cst_8 : f32 to vector<16x1xf32>
    %20 = arith.divf %18, %19 : vector<16x1xf32>
    %21 = vector.broadcast %20 : vector<16x1xf32> to vector<16x32xf32>
    %22 = arith.subf %14, %21 : vector<16x32xf32>
    %23 = arith.mulf %22, %22 : vector<16x32xf32>
    %cst_9 = arith.constant dense<0.000000e+00> : vector<16xf32>
    %24 = vector.multi_reduction <add>, %23, %cst_9 [1] : vector<16x32xf32> to vector<16xf32>
    %25 = vector.shape_cast %24 : vector<16xf32> to vector<16x1xf32>
    %cst_10 = arith.constant 3.200000e+01 : f32
    %26 = vector.broadcast %cst_10 : f32 to vector<16x1xf32>
    %27 = arith.divf %25, %26 : vector<16x1xf32>
    %28 = vector.broadcast %20 : vector<16x1xf32> to vector<16x32xf32>
    %29 = arith.subf %14, %28 : vector<16x32xf32>
    %cst_11 = arith.constant 9.99999996E-13 : f32
    %30 = vector.broadcast %cst_11 : f32 to vector<16x1xf32>
    %31 = arith.addf %27, %30 : vector<16x1xf32>
    %32 = math.rsqrt %31 : vector<16x1xf32>
    %33 = vector.broadcast %32 : vector<16x1xf32> to vector<16x32xf32>
    %34 = arith.mulf %29, %33 : vector<16x32xf32>
    %35 = vector.broadcast %15 : vector<1x32xf32> to vector<16x32xf32>
    %36 = arith.mulf %34, %35 : vector<16x32xf32>
    %37 = vector.broadcast %16 : vector<1x32xf32> to vector<16x32xf32>
    %38 = arith.addf %36, %37 : vector<16x32xf32>
    %c0_12 = arith.constant 0 : index
    %c0_13 = arith.constant 0 : index
    %39 = vector.load %arg1[%c0_12, %c0_13] : memref<2x8xf32, #tpu.memory_space<vmem>>, vector<2x8xf32>
    %40 = arith.truncf %38 : vector<16x32xf32> to vector<16x32xbf16>
    %c0_14 = arith.constant 0 : index
    %c0_15 = arith.constant 0 : index
    %c0_16 = arith.constant 0 : index
    %41 = vector.load %arg5[%c0_14, %c0_15, %c0_16] : memref<12x32x16xbf16, #tpu.memory_space<vmem>>, vector<1x32x16xbf16>
    %42 = vector.shape_cast %41 : vector<1x32x16xbf16> to vector<32x16xbf16>
    %c2 = arith.constant 2 : index
    %c0_17 = arith.constant 0 : index
    %c0_18 = arith.constant 0 : index
    %43 = vector.load %arg5[%c2, %c0_17, %c0_18] : memref<12x32x16xbf16, #tpu.memory_space<vmem>>, vector<1x32x16xbf16>
    %44 = vector.shape_cast %43 : vector<1x32x16xbf16> to vector<32x16xbf16>
    %c4 = arith.constant 4 : index
    %c0_19 = arith.constant 0 : index
    %c0_20 = arith.constant 0 : index
    %45 = vector.load %arg5[%c4, %c0_19, %c0_20] : memref<12x32x16xbf16, #tpu.memory_space<vmem>>, vector<1x32x16xbf16>
    %46 = vector.shape_cast %45 : vector<1x32x16xbf16> to vector<32x16xbf16>
    %cst_21 = arith.constant dense<0.000000e+00> : vector<16x16xf32>
    %47 = tpu.matmul %40, %42, %cst_21 {dimension_numbers = #tpu.dot_dimension_numbers<[1], [0], [0], [1], [0, 0, 1, 1], [], []>} : vector<16x32xbf16>, vector<32x16xbf16>, vector<16x16xf32> -> vector<16x16xf32>
    %48 = vector.extract_strided_slice %0 {offsets = [2, 0], sizes = [1, 16], strides = [1, 1]} : vector<40x128xf32> to vector<1x16xf32>
    %49 = vector.broadcast %48 : vector<1x16xf32> to vector<16x16xf32>
    %50 = arith.addf %47, %49 : vector<16x16xf32>
    %cst_22 = arith.constant 2.500000e-01 : f32
    %51 = vector.broadcast %cst_22 : f32 to vector<16x16xf32>
    %52 = arith.mulf %50, %51 : vector<16x16xf32>
    %cst_23 = arith.constant dense<0.000000e+00> : vector<16x16xf32>
    %53 = tpu.matmul %40, %44, %cst_23 {dimension_numbers = #tpu.dot_dimension_numbers<[1], [0], [0], [1], [0, 0, 1, 1], [], []>} : vector<16x32xbf16>, vector<32x16xbf16>, vector<16x16xf32> -> vector<16x16xf32>
    %54 = vector.extract_strided_slice %0 {offsets = [4, 0], sizes = [1, 16], strides = [1, 1]} : vector<40x128xf32> to vector<1x16xf32>
    %55 = vector.broadcast %54 : vector<1x16xf32> to vector<16x16xf32>
    %56 = arith.addf %53, %55 : vector<16x16xf32>
    %cst_24 = arith.constant dense<0.000000e+00> : vector<16x16xf32>
    %57 = tpu.matmul %40, %46, %cst_24 {dimension_numbers = #tpu.dot_dimension_numbers<[1], [0], [0], [1], [0, 0, 1, 1], [], []>} : vector<16x32xbf16>, vector<32x16xbf16>, vector<16x16xf32> -> vector<16x16xf32>
    %58 = vector.extract_strided_slice %0 {offsets = [6, 0], sizes = [1, 16], strides = [1, 1]} : vector<40x128xf32> to vector<1x16xf32>
    %59 = vector.broadcast %58 : vector<1x16xf32> to vector<16x16xf32>
    %60 = arith.addf %57, %59 : vector<16x16xf32>
    %61 = arith.truncf %52 : vector<16x16xf32> to vector<16x16xbf16>
    %62 = arith.truncf %56 : vector<16x16xf32> to vector<16x16xbf16>
    %63 = arith.truncf %60 : vector<16x16xf32> to vector<16x16xbf16>
    %c1 = arith.constant 1 : index
    %c0_25 = arith.constant 0 : index
    %c0_26 = arith.constant 0 : index
    %64 = vector.load %arg5[%c1, %c0_25, %c0_26] : memref<12x32x16xbf16, #tpu.memory_space<vmem>>, vector<1x32x16xbf16>
    %65 = vector.shape_cast %64 : vector<1x32x16xbf16> to vector<32x16xbf16>
    %c3 = arith.constant 3 : index
    %c0_27 = arith.constant 0 : index
    %c0_28 = arith.constant 0 : index
    %66 = vector.load %arg5[%c3, %c0_27, %c0_28] : memref<12x32x16xbf16, #tpu.memory_space<vmem>>, vector<1x32x16xbf16>
    %67 = vector.shape_cast %66 : vector<1x32x16xbf16> to vector<32x16xbf16>
    %c5 = arith.constant 5 : index
    %c0_29 = arith.constant 0 : index
    %c0_30 = arith.constant 0 : index
    %68 = vector.load %arg5[%c5, %c0_29, %c0_30] : memref<12x32x16xbf16, #tpu.memory_space<vmem>>, vector<1x32x16xbf16>
    %69 = vector.shape_cast %68 : vector<1x32x16xbf16> to vector<32x16xbf16>
    %cst_31 = arith.constant dense<0.000000e+00> : vector<16x16xf32>
    %70 = tpu.matmul %40, %65, %cst_31 {dimension_numbers = #tpu.dot_dimension_numbers<[1], [0], [0], [1], [0, 0, 1, 1], [], []>} : vector<16x32xbf16>, vector<32x16xbf16>, vector<16x16xf32> -> vector<16x16xf32>
    %71 = vector.extract_strided_slice %0 {offsets = [3, 0], sizes = [1, 16], strides = [1, 1]} : vector<40x128xf32> to vector<1x16xf32>
    %72 = vector.broadcast %71 : vector<1x16xf32> to vector<16x16xf32>
    %73 = arith.addf %70, %72 : vector<16x16xf32>
    %cst_32 = arith.constant 2.500000e-01 : f32
    %74 = vector.broadcast %cst_32 : f32 to vector<16x16xf32>
    %75 = arith.mulf %73, %74 : vector<16x16xf32>
    %cst_33 = arith.constant dense<0.000000e+00> : vector<16x16xf32>
    %76 = tpu.matmul %40, %67, %cst_33 {dimension_numbers = #tpu.dot_dimension_numbers<[1], [0], [0], [1], [0, 0, 1, 1], [], []>} : vector<16x32xbf16>, vector<32x16xbf16>, vector<16x16xf32> -> vector<16x16xf32>
    %77 = vector.extract_strided_slice %0 {offsets = [5, 0], sizes = [1, 16], strides = [1, 1]} : vector<40x128xf32> to vector<1x16xf32>
    %78 = vector.broadcast %77 : vector<1x16xf32> to vector<16x16xf32>
    %79 = arith.addf %76, %78 : vector<16x16xf32>
    %cst_34 = arith.constant dense<0.000000e+00> : vector<16x16xf32>
    %80 = tpu.matmul %40, %69, %cst_34 {dimension_numbers = #tpu.dot_dimension_numbers<[1], [0], [0], [1], [0, 0, 1, 1], [], []>} : vector<16x32xbf16>, vector<32x16xbf16>, vector<16x16xf32> -> vector<16x16xf32>
    %81 = vector.extract_strided_slice %0 {offsets = [7, 0], sizes = [1, 16], strides = [1, 1]} : vector<40x128xf32> to vector<1x16xf32>
    %82 = vector.broadcast %81 : vector<1x16xf32> to vector<16x16xf32>
    %83 = arith.addf %80, %82 : vector<16x16xf32>
    %84 = arith.truncf %75 : vector<16x16xf32> to vector<16x16xbf16>
    %85 = arith.truncf %79 : vector<16x16xf32> to vector<16x16xbf16>
    %86 = arith.truncf %83 : vector<16x16xf32> to vector<16x16xbf16>
    %87 = vector.extract_strided_slice %39 {offsets = [0, 0], sizes = [1, 8], strides = [1, 1]} : vector<2x8xf32> to vector<1x8xf32>
    %88 = vector.extract_strided_slice %61 {offsets = [0, 0], sizes = [8, 16], strides = [1, 1]} : vector<16x16xbf16> to vector<8x16xbf16>
    %89 = vector.extract_strided_slice %62 {offsets = [0, 0], sizes = [8, 16], strides = [1, 1]} : vector<16x16xbf16> to vector<8x16xbf16>
    %90 = vector.extract_strided_slice %63 {offsets = [0, 0], sizes = [8, 16], strides = [1, 1]} : vector<16x16xbf16> to vector<8x16xbf16>
    %cst_35 = arith.constant dense<0.000000e+00> : vector<8x8xf32>
    %91 = tpu.matmul %88, %89, %cst_35 {dimension_numbers = #tpu.dot_dimension_numbers<[1], [1], [0], [0], [0, 0, 1, 0], [], []>} : vector<8x16xbf16>, vector<8x16xbf16>, vector<8x8xf32> -> vector<8x8xf32>
    %92 = vector.broadcast %87 : vector<1x8xf32> to vector<8x8xf32>
    %93 = arith.addf %91, %92 : vector<8x8xf32>
    %cst_36 = arith.constant dense<0xFF800000> : vector<8xf32>
    %94 = vector.multi_reduction <maximumf>, %93, %cst_36 [1] : vector<8x8xf32> to vector<8xf32>
    %95 = vector.shape_cast %94 : vector<8xf32> to vector<8x1xf32>
    %96 = vector.broadcast %95 : vector<8x1xf32> to vector<8x8xf32>
    %97 = arith.subf %93, %96 : vector<8x8xf32>
    %98 = math.exp %97 : vector<8x8xf32>
    %cst_37 = arith.constant dense<0.000000e+00> : vector<8xf32>
    %99 = vector.multi_reduction <add>, %98, %cst_37 [1] : vector<8x8xf32> to vector<8xf32>
    %100 = vector.shape_cast %99 : vector<8xf32> to vector<8x1xf32>
    %101 = arith.truncf %98 : vector<8x8xf32> to vector<8x8xbf16>
    %cst_38 = arith.constant dense<0.000000e+00> : vector<8x16xf32>
    %102 = tpu.matmul %101, %90, %cst_38 {dimension_numbers = #tpu.dot_dimension_numbers<[1], [0], [0], [1], [0, 0, 1, 1], [], []>} : vector<8x8xbf16>, vector<8x16xbf16>, vector<8x16xf32> -> vector<8x16xf32>
    %103 = tpu.reciprocal %100 {approx = true} : vector<8x1xf32> -> vector<8x1xf32>
    %104 = vector.broadcast %103 : vector<8x1xf32> to vector<8x16xf32>
    %105 = arith.mulf %102, %104 : vector<8x16xf32>
    %106 = arith.truncf %105 : vector<8x16xf32> to vector<8x16xbf16>
    %c0_39 = arith.constant 0 : index
    %c0_40 = arith.constant 0 : index
    %c0_41 = arith.constant 0 : index
    %107 = vector.load %arg6[%c0_39, %c0_40, %c0_41] : memref<4x16x32xbf16, #tpu.memory_space<vmem>>, vector<1x16x32xbf16>
    %108 = vector.shape_cast %107 : vector<1x16x32xbf16> to vector<16x32xbf16>
    %cst_42 = arith.constant dense<0.000000e+00> : vector<8x32xf32>
    %109 = tpu.matmul %106, %108, %cst_42 {dimension_numbers = #tpu.dot_dimension_numbers<[1], [0], [0], [1], [0, 0, 1, 1], [], []>} : vector<8x16xbf16>, vector<16x32xbf16>, vector<8x32xf32> -> vector<8x32xf32>
    %110 = vector.extract_strided_slice %84 {offsets = [0, 0], sizes = [8, 16], strides = [1, 1]} : vector<16x16xbf16> to vector<8x16xbf16>
    %111 = vector.extract_strided_slice %85 {offsets = [0, 0], sizes = [8, 16], strides = [1, 1]} : vector<16x16xbf16> to vector<8x16xbf16>
    %112 = vector.extract_strided_slice %86 {offsets = [0, 0], sizes = [8, 16], strides = [1, 1]} : vector<16x16xbf16> to vector<8x16xbf16>
    %cst_43 = arith.constant dense<0.000000e+00> : vector<8x8xf32>
    %113 = tpu.matmul %110, %111, %cst_43 {dimension_numbers = #tpu.dot_dimension_numbers<[1], [1], [0], [0], [0, 0, 1, 0], [], []>} : vector<8x16xbf16>, vector<8x16xbf16>, vector<8x8xf32> -> vector<8x8xf32>
    %114 = vector.broadcast %87 : vector<1x8xf32> to vector<8x8xf32>
    %115 = arith.addf %113, %114 : vector<8x8xf32>
    %cst_44 = arith.constant dense<0xFF800000> : vector<8xf32>
    %116 = vector.multi_reduction <maximumf>, %115, %cst_44 [1] : vector<8x8xf32> to vector<8xf32>
    %117 = vector.shape_cast %116 : vector<8xf32> to vector<8x1xf32>
    %118 = vector.broadcast %117 : vector<8x1xf32> to vector<8x8xf32>
    %119 = arith.subf %115, %118 : vector<8x8xf32>
    %120 = math.exp %119 : vector<8x8xf32>
    %cst_45 = arith.constant dense<0.000000e+00> : vector<8xf32>
    %121 = vector.multi_reduction <add>, %120, %cst_45 [1] : vector<8x8xf32> to vector<8xf32>
    %122 = vector.shape_cast %121 : vector<8xf32> to vector<8x1xf32>
    %123 = arith.truncf %120 : vector<8x8xf32> to vector<8x8xbf16>
    %cst_46 = arith.constant dense<0.000000e+00> : vector<8x16xf32>
    %124 = tpu.matmul %123, %112, %cst_46 {dimension_numbers = #tpu.dot_dimension_numbers<[1], [0], [0], [1], [0, 0, 1, 1], [], []>} : vector<8x8xbf16>, vector<8x16xbf16>, vector<8x16xf32> -> vector<8x16xf32>
    %125 = tpu.reciprocal %122 {approx = true} : vector<8x1xf32> -> vector<8x1xf32>
    %126 = vector.broadcast %125 : vector<8x1xf32> to vector<8x16xf32>
    %127 = arith.mulf %124, %126 : vector<8x16xf32>
    %128 = arith.truncf %127 : vector<8x16xf32> to vector<8x16xbf16>
    %c1_47 = arith.constant 1 : index
    %c0_48 = arith.constant 0 : index
    %c0_49 = arith.constant 0 : index
    %129 = vector.load %arg6[%c1_47, %c0_48, %c0_49] : memref<4x16x32xbf16, #tpu.memory_space<vmem>>, vector<1x16x32xbf16>
    %130 = vector.shape_cast %129 : vector<1x16x32xbf16> to vector<16x32xbf16>
    %cst_50 = arith.constant dense<0.000000e+00> : vector<8x32xf32>
    %131 = tpu.matmul %128, %130, %cst_50 {dimension_numbers = #tpu.dot_dimension_numbers<[1], [0], [0], [1], [0, 0, 1, 1], [], []>} : vector<8x16xbf16>, vector<16x32xbf16>, vector<8x32xf32> -> vector<8x32xf32>
    %132 = arith.addf %109, %131 : vector<8x32xf32>
    %133 = vector.extract_strided_slice %39 {offsets = [1, 0], sizes = [1, 8], strides = [1, 1]} : vector<2x8xf32> to vector<1x8xf32>
    %134 = vector.extract_strided_slice %61 {offsets = [8, 0], sizes = [8, 16], strides = [1, 1]} : vector<16x16xbf16> to vector<8x16xbf16>
    %135 = vector.extract_strided_slice %62 {offsets = [8, 0], sizes = [8, 16], strides = [1, 1]} : vector<16x16xbf16> to vector<8x16xbf16>
    %136 = vector.extract_strided_slice %63 {offsets = [8, 0], sizes = [8, 16], strides = [1, 1]} : vector<16x16xbf16> to vector<8x16xbf16>
    %cst_51 = arith.constant dense<0.000000e+00> : vector<8x8xf32>
    %137 = tpu.matmul %134, %135, %cst_51 {dimension_numbers = #tpu.dot_dimension_numbers<[1], [1], [0], [0], [0, 0, 1, 0], [], []>} : vector<8x16xbf16>, vector<8x16xbf16>, vector<8x8xf32> -> vector<8x8xf32>
    %138 = vector.broadcast %133 : vector<1x8xf32> to vector<8x8xf32>
    %139 = arith.addf %137, %138 : vector<8x8xf32>
    %cst_52 = arith.constant dense<0xFF800000> : vector<8xf32>
    %140 = vector.multi_reduction <maximumf>, %139, %cst_52 [1] : vector<8x8xf32> to vector<8xf32>
    %141 = vector.shape_cast %140 : vector<8xf32> to vector<8x1xf32>
    %142 = vector.broadcast %141 : vector<8x1xf32> to vector<8x8xf32>
    %143 = arith.subf %139, %142 : vector<8x8xf32>
    %144 = math.exp %143 : vector<8x8xf32>
    %cst_53 = arith.constant dense<0.000000e+00> : vector<8xf32>
    %145 = vector.multi_reduction <add>, %144, %cst_53 [1] : vector<8x8xf32> to vector<8xf32>
    %146 = vector.shape_cast %145 : vector<8xf32> to vector<8x1xf32>
    %147 = arith.truncf %144 : vector<8x8xf32> to vector<8x8xbf16>
    %cst_54 = arith.constant dense<0.000000e+00> : vector<8x16xf32>
    %148 = tpu.matmul %147, %136, %cst_54 {dimension_numbers = #tpu.dot_dimension_numbers<[1], [0], [0], [1], [0, 0, 1, 1], [], []>} : vector<8x8xbf16>, vector<8x16xbf16>, vector<8x16xf32> -> vector<8x16xf32>
    %149 = tpu.reciprocal %146 {approx = true} : vector<8x1xf32> -> vector<8x1xf32>
    %150 = vector.broadcast %149 : vector<8x1xf32> to vector<8x16xf32>
    %151 = arith.mulf %148, %150 : vector<8x16xf32>
    %152 = arith.truncf %151 : vector<8x16xf32> to vector<8x16xbf16>
    %c0_55 = arith.constant 0 : index
    %c0_56 = arith.constant 0 : index
    %c0_57 = arith.constant 0 : index
    %153 = vector.load %arg6[%c0_55, %c0_56, %c0_57] : memref<4x16x32xbf16, #tpu.memory_space<vmem>>, vector<1x16x32xbf16>
    %154 = vector.shape_cast %153 : vector<1x16x32xbf16> to vector<16x32xbf16>
    %cst_58 = arith.constant dense<0.000000e+00> : vector<8x32xf32>
    %155 = tpu.matmul %152, %154, %cst_58 {dimension_numbers = #tpu.dot_dimension_numbers<[1], [0], [0], [1], [0, 0, 1, 1], [], []>} : vector<8x16xbf16>, vector<16x32xbf16>, vector<8x32xf32> -> vector<8x32xf32>
    %156 = vector.extract_strided_slice %84 {offsets = [8, 0], sizes = [8, 16], strides = [1, 1]} : vector<16x16xbf16> to vector<8x16xbf16>
    %157 = vector.extract_strided_slice %85 {offsets = [8, 0], sizes = [8, 16], strides = [1, 1]} : vector<16x16xbf16> to vector<8x16xbf16>
    %158 = vector.extract_strided_slice %86 {offsets = [8, 0], sizes = [8, 16], strides = [1, 1]} : vector<16x16xbf16> to vector<8x16xbf16>
    %cst_59 = arith.constant dense<0.000000e+00> : vector<8x8xf32>
    %159 = tpu.matmul %156, %157, %cst_59 {dimension_numbers = #tpu.dot_dimension_numbers<[1], [1], [0], [0], [0, 0, 1, 0], [], []>} : vector<8x16xbf16>, vector<8x16xbf16>, vector<8x8xf32> -> vector<8x8xf32>
    %160 = vector.broadcast %133 : vector<1x8xf32> to vector<8x8xf32>
    %161 = arith.addf %159, %160 : vector<8x8xf32>
    %cst_60 = arith.constant dense<0xFF800000> : vector<8xf32>
    %162 = vector.multi_reduction <maximumf>, %161, %cst_60 [1] : vector<8x8xf32> to vector<8xf32>
    %163 = vector.shape_cast %162 : vector<8xf32> to vector<8x1xf32>
    %164 = vector.broadcast %163 : vector<8x1xf32> to vector<8x8xf32>
    %165 = arith.subf %161, %164 : vector<8x8xf32>
    %166 = math.exp %165 : vector<8x8xf32>
    %cst_61 = arith.constant dense<0.000000e+00> : vector<8xf32>
    %167 = vector.multi_reduction <add>, %166, %cst_61 [1] : vector<8x8xf32> to vector<8xf32>
    %168 = vector.shape_cast %167 : vector<8xf32> to vector<8x1xf32>
    %169 = arith.truncf %166 : vector<8x8xf32> to vector<8x8xbf16>
    %cst_62 = arith.constant dense<0.000000e+00> : vector<8x16xf32>
    %170 = tpu.matmul %169, %158, %cst_62 {dimension_numbers = #tpu.dot_dimension_numbers<[1], [0], [0], [1], [0, 0, 1, 1], [], []>} : vector<8x8xbf16>, vector<8x16xbf16>, vector<8x16xf32> -> vector<8x16xf32>
    %171 = tpu.reciprocal %168 {approx = true} : vector<8x1xf32> -> vector<8x1xf32>
    %172 = vector.broadcast %171 : vector<8x1xf32> to vector<8x16xf32>
    %173 = arith.mulf %170, %172 : vector<8x16xf32>
    %174 = arith.truncf %173 : vector<8x16xf32> to vector<8x16xbf16>
    %c1_63 = arith.constant 1 : index
    %c0_64 = arith.constant 0 : index
    %c0_65 = arith.constant 0 : index
    %175 = vector.load %arg6[%c1_63, %c0_64, %c0_65] : memref<4x16x32xbf16, #tpu.memory_space<vmem>>, vector<1x16x32xbf16>
    %176 = vector.shape_cast %175 : vector<1x16x32xbf16> to vector<16x32xbf16>
    %cst_66 = arith.constant dense<0.000000e+00> : vector<8x32xf32>
    %177 = tpu.matmul %174, %176, %cst_66 {dimension_numbers = #tpu.dot_dimension_numbers<[1], [0], [0], [1], [0, 0, 1, 1], [], []>} : vector<8x16xbf16>, vector<16x32xbf16>, vector<8x32xf32> -> vector<8x32xf32>
    %178 = arith.addf %155, %177 : vector<8x32xf32>
    %179 = tpu.concatenate %132, %178 in 0 : vector<8x32xf32>, vector<8x32xf32> -> vector<16x32xf32>
    %180 = vector.extract_strided_slice %0 {offsets = [8, 0], sizes = [1, 32], strides = [1, 1]} : vector<40x128xf32> to vector<1x32xf32>
    %181 = vector.broadcast %180 : vector<1x32xf32> to vector<16x32xf32>
    %182 = arith.addf %179, %181 : vector<16x32xf32>
    %183 = arith.addf %182, %38 : vector<16x32xf32>
    %184 = vector.extract_strided_slice %0 {offsets = [9, 0], sizes = [1, 32], strides = [1, 1]} : vector<40x128xf32> to vector<1x32xf32>
    %185 = vector.extract_strided_slice %0 {offsets = [10, 0], sizes = [1, 32], strides = [1, 1]} : vector<40x128xf32> to vector<1x32xf32>
    %cst_67 = arith.constant dense<0.000000e+00> : vector<16xf32>
    %186 = vector.multi_reduction <add>, %183, %cst_67 [1] : vector<16x32xf32> to vector<16xf32>
    %187 = vector.shape_cast %186 : vector<16xf32> to vector<16x1xf32>
    %cst_68 = arith.constant 3.200000e+01 : f32
    %188 = vector.broadcast %cst_68 : f32 to vector<16x1xf32>
    %189 = arith.divf %187, %188 : vector<16x1xf32>
    %190 = vector.broadcast %189 : vector<16x1xf32> to vector<16x32xf32>
    %191 = arith.subf %183, %190 : vector<16x32xf32>
    %192 = arith.mulf %191, %191 : vector<16x32xf32>
    %cst_69 = arith.constant dense<0.000000e+00> : vector<16xf32>
    %193 = vector.multi_reduction <add>, %192, %cst_69 [1] : vector<16x32xf32> to vector<16xf32>
    %194 = vector.shape_cast %193 : vector<16xf32> to vector<16x1xf32>
    %cst_70 = arith.constant 3.200000e+01 : f32
    %195 = vector.broadcast %cst_70 : f32 to vector<16x1xf32>
    %196 = arith.divf %194, %195 : vector<16x1xf32>
    %197 = vector.broadcast %189 : vector<16x1xf32> to vector<16x32xf32>
    %198 = arith.subf %183, %197 : vector<16x32xf32>
    %cst_71 = arith.constant 9.99999996E-13 : f32
    %199 = vector.broadcast %cst_71 : f32 to vector<16x1xf32>
    %200 = arith.addf %196, %199 : vector<16x1xf32>
    %201 = math.rsqrt %200 : vector<16x1xf32>
    %202 = vector.broadcast %201 : vector<16x1xf32> to vector<16x32xf32>
    %203 = arith.mulf %198, %202 : vector<16x32xf32>
    %204 = vector.broadcast %184 : vector<1x32xf32> to vector<16x32xf32>
    %205 = arith.mulf %203, %204 : vector<16x32xf32>
    %206 = vector.broadcast %185 : vector<1x32xf32> to vector<16x32xf32>
    %207 = arith.addf %205, %206 : vector<16x32xf32>
    %208 = arith.truncf %207 : vector<16x32xf32> to vector<16x32xbf16>
    %c0_72 = arith.constant 0 : index
    %c0_73 = arith.constant 0 : index
    %c0_74 = arith.constant 0 : index
    %209 = vector.load %arg7[%c0_72, %c0_73, %c0_74] : memref<2x32x64xbf16, #tpu.memory_space<vmem>>, vector<1x32x64xbf16>
    %210 = vector.shape_cast %209 : vector<1x32x64xbf16> to vector<32x64xbf16>
    %cst_75 = arith.constant dense<0.000000e+00> : vector<16x64xf32>
    %211 = tpu.matmul %208, %210, %cst_75 {dimension_numbers = #tpu.dot_dimension_numbers<[1], [0], [0], [1], [0, 0, 1, 1], [], []>} : vector<16x32xbf16>, vector<32x64xbf16>, vector<16x64xf32> -> vector<16x64xf32>
    %212 = vector.extract_strided_slice %0 {offsets = [11, 0], sizes = [1, 64], strides = [1, 1]} : vector<40x128xf32> to vector<1x64xf32>
    %213 = vector.broadcast %212 : vector<1x64xf32> to vector<16x64xf32>
    %214 = arith.addf %211, %213 : vector<16x64xf32>
    %215 = arith.mulf %214, %214 : vector<16x64xf32>
    %216 = arith.mulf %214, %215 : vector<16x64xf32>
    %cst_76 = arith.constant 4.471500e-02 : f32
    %217 = vector.broadcast %cst_76 : f32 to vector<16x64xf32>
    %218 = arith.mulf %217, %216 : vector<16x64xf32>
    %219 = arith.addf %214, %218 : vector<16x64xf32>
    %cst_77 = arith.constant 0.797884583 : f32
    %220 = vector.broadcast %cst_77 : f32 to vector<16x64xf32>
    %221 = arith.mulf %220, %219 : vector<16x64xf32>
    %222 = math.tanh %221 : vector<16x64xf32>
    %cst_78 = arith.constant 1.000000e+00 : f32
    %223 = vector.broadcast %cst_78 : f32 to vector<16x64xf32>
    %224 = arith.addf %223, %222 : vector<16x64xf32>
    %cst_79 = arith.constant 5.000000e-01 : f32
    %225 = vector.broadcast %cst_79 : f32 to vector<16x64xf32>
    %226 = arith.mulf %225, %224 : vector<16x64xf32>
    %227 = arith.mulf %214, %226 : vector<16x64xf32>
    %228 = arith.truncf %227 : vector<16x64xf32> to vector<16x64xbf16>
    %c0_80 = arith.constant 0 : index
    %c0_81 = arith.constant 0 : index
    %c0_82 = arith.constant 0 : index
    %229 = vector.load %arg8[%c0_80, %c0_81, %c0_82] : memref<2x64x32xbf16, #tpu.memory_space<vmem>>, vector<1x64x32xbf16>
    %230 = vector.shape_cast %229 : vector<1x64x32xbf16> to vector<64x32xbf16>
    %cst_83 = arith.constant dense<0.000000e+00> : vector<16x32xf32>
    %231 = tpu.matmul %228, %230, %cst_83 {dimension_numbers = #tpu.dot_dimension_numbers<[1], [0], [0], [1], [0, 0, 1, 1], [], []>} : vector<16x64xbf16>, vector<64x32xbf16>, vector<16x32xf32> -> vector<16x32xf32>
    %232 = vector.extract_strided_slice %0 {offsets = [12, 0], sizes = [1, 32], strides = [1, 1]} : vector<40x128xf32> to vector<1x32xf32>
    %233 = vector.broadcast %232 : vector<1x32xf32> to vector<16x32xf32>
    %234 = arith.addf %231, %233 : vector<16x32xf32>
    %235 = arith.addf %234, %207 : vector<16x32xf32>
    %236 = vector.extract_strided_slice %0 {offsets = [13, 0], sizes = [1, 32], strides = [1, 1]} : vector<40x128xf32> to vector<1x32xf32>
    %237 = vector.extract_strided_slice %0 {offsets = [14, 0], sizes = [1, 32], strides = [1, 1]} : vector<40x128xf32> to vector<1x32xf32>
    %cst_84 = arith.constant dense<0.000000e+00> : vector<16xf32>
    %238 = vector.multi_reduction <add>, %235, %cst_84 [1] : vector<16x32xf32> to vector<16xf32>
    %239 = vector.shape_cast %238 : vector<16xf32> to vector<16x1xf32>
    %cst_85 = arith.constant 3.200000e+01 : f32
    %240 = vector.broadcast %cst_85 : f32 to vector<16x1xf32>
    %241 = arith.divf %239, %240 : vector<16x1xf32>
    %242 = vector.broadcast %241 : vector<16x1xf32> to vector<16x32xf32>
    %243 = arith.subf %235, %242 : vector<16x32xf32>
    %244 = arith.mulf %243, %243 : vector<16x32xf32>
    %cst_86 = arith.constant dense<0.000000e+00> : vector<16xf32>
    %245 = vector.multi_reduction <add>, %244, %cst_86 [1] : vector<16x32xf32> to vector<16xf32>
    %246 = vector.shape_cast %245 : vector<16xf32> to vector<16x1xf32>
    %cst_87 = arith.constant 3.200000e+01 : f32
    %247 = vector.broadcast %cst_87 : f32 to vector<16x1xf32>
    %248 = arith.divf %246, %247 : vector<16x1xf32>
    %249 = vector.broadcast %241 : vector<16x1xf32> to vector<16x32xf32>
    %250 = arith.subf %235, %249 : vector<16x32xf32>
    %cst_88 = arith.constant 9.99999996E-13 : f32
    %251 = vector.broadcast %cst_88 : f32 to vector<16x1xf32>
    %252 = arith.addf %248, %251 : vector<16x1xf32>
    %253 = math.rsqrt %252 : vector<16x1xf32>
    %254 = vector.broadcast %253 : vector<16x1xf32> to vector<16x32xf32>
    %255 = arith.mulf %250, %254 : vector<16x32xf32>
    %256 = vector.broadcast %236 : vector<1x32xf32> to vector<16x32xf32>
    %257 = arith.mulf %255, %256 : vector<16x32xf32>
    %258 = vector.broadcast %237 : vector<1x32xf32> to vector<16x32xf32>
    %259 = arith.addf %257, %258 : vector<16x32xf32>
    %260 = arith.truncf %259 : vector<16x32xf32> to vector<16x32xbf16>
    %c6 = arith.constant 6 : index
    %c0_89 = arith.constant 0 : index
    %c0_90 = arith.constant 0 : index
    %261 = vector.load %arg5[%c6, %c0_89, %c0_90] : memref<12x32x16xbf16, #tpu.memory_space<vmem>>, vector<1x32x16xbf16>
    %262 = vector.shape_cast %261 : vector<1x32x16xbf16> to vector<32x16xbf16>
    %c8 = arith.constant 8 : index
    %c0_91 = arith.constant 0 : index
    %c0_92 = arith.constant 0 : index
    %263 = vector.load %arg5[%c8, %c0_91, %c0_92] : memref<12x32x16xbf16, #tpu.memory_space<vmem>>, vector<1x32x16xbf16>
    %264 = vector.shape_cast %263 : vector<1x32x16xbf16> to vector<32x16xbf16>
    %c10 = arith.constant 10 : index
    %c0_93 = arith.constant 0 : index
    %c0_94 = arith.constant 0 : index
    %265 = vector.load %arg5[%c10, %c0_93, %c0_94] : memref<12x32x16xbf16, #tpu.memory_space<vmem>>, vector<1x32x16xbf16>
    %266 = vector.shape_cast %265 : vector<1x32x16xbf16> to vector<32x16xbf16>
    %cst_95 = arith.constant dense<0.000000e+00> : vector<16x16xf32>
    %267 = tpu.matmul %260, %262, %cst_95 {dimension_numbers = #tpu.dot_dimension_numbers<[1], [0], [0], [1], [0, 0, 1, 1], [], []>} : vector<16x32xbf16>, vector<32x16xbf16>, vector<16x16xf32> -> vector<16x16xf32>
    %268 = vector.extract_strided_slice %0 {offsets = [15, 0], sizes = [1, 16], strides = [1, 1]} : vector<40x128xf32> to vector<1x16xf32>
    %269 = vector.broadcast %268 : vector<1x16xf32> to vector<16x16xf32>
    %270 = arith.addf %267, %269 : vector<16x16xf32>
    %cst_96 = arith.constant 2.500000e-01 : f32
    %271 = vector.broadcast %cst_96 : f32 to vector<16x16xf32>
    %272 = arith.mulf %270, %271 : vector<16x16xf32>
    %cst_97 = arith.constant dense<0.000000e+00> : vector<16x16xf32>
    %273 = tpu.matmul %260, %264, %cst_97 {dimension_numbers = #tpu.dot_dimension_numbers<[1], [0], [0], [1], [0, 0, 1, 1], [], []>} : vector<16x32xbf16>, vector<32x16xbf16>, vector<16x16xf32> -> vector<16x16xf32>
    %274 = vector.extract_strided_slice %0 {offsets = [17, 0], sizes = [1, 16], strides = [1, 1]} : vector<40x128xf32> to vector<1x16xf32>
    %275 = vector.broadcast %274 : vector<1x16xf32> to vector<16x16xf32>
    %276 = arith.addf %273, %275 : vector<16x16xf32>
    %cst_98 = arith.constant dense<0.000000e+00> : vector<16x16xf32>
    %277 = tpu.matmul %260, %266, %cst_98 {dimension_numbers = #tpu.dot_dimension_numbers<[1], [0], [0], [1], [0, 0, 1, 1], [], []>} : vector<16x32xbf16>, vector<32x16xbf16>, vector<16x16xf32> -> vector<16x16xf32>
    %278 = vector.extract_strided_slice %0 {offsets = [19, 0], sizes = [1, 16], strides = [1, 1]} : vector<40x128xf32> to vector<1x16xf32>
    %279 = vector.broadcast %278 : vector<1x16xf32> to vector<16x16xf32>
    %280 = arith.addf %277, %279 : vector<16x16xf32>
    %281 = arith.truncf %272 : vector<16x16xf32> to vector<16x16xbf16>
    %282 = arith.truncf %276 : vector<16x16xf32> to vector<16x16xbf16>
    %283 = arith.truncf %280 : vector<16x16xf32> to vector<16x16xbf16>
    %c7 = arith.constant 7 : index
    %c0_99 = arith.constant 0 : index
    %c0_100 = arith.constant 0 : index
    %284 = vector.load %arg5[%c7, %c0_99, %c0_100] : memref<12x32x16xbf16, #tpu.memory_space<vmem>>, vector<1x32x16xbf16>
    %285 = vector.shape_cast %284 : vector<1x32x16xbf16> to vector<32x16xbf16>
    %c9 = arith.constant 9 : index
    %c0_101 = arith.constant 0 : index
    %c0_102 = arith.constant 0 : index
    %286 = vector.load %arg5[%c9, %c0_101, %c0_102] : memref<12x32x16xbf16, #tpu.memory_space<vmem>>, vector<1x32x16xbf16>
    %287 = vector.shape_cast %286 : vector<1x32x16xbf16> to vector<32x16xbf16>
    %c11 = arith.constant 11 : index
    %c0_103 = arith.constant 0 : index
    %c0_104 = arith.constant 0 : index
    %288 = vector.load %arg5[%c11, %c0_103, %c0_104] : memref<12x32x16xbf16, #tpu.memory_space<vmem>>, vector<1x32x16xbf16>
    %289 = vector.shape_cast %288 : vector<1x32x16xbf16> to vector<32x16xbf16>
    %cst_105 = arith.constant dense<0.000000e+00> : vector<16x16xf32>
    %290 = tpu.matmul %260, %285, %cst_105 {dimension_numbers = #tpu.dot_dimension_numbers<[1], [0], [0], [1], [0, 0, 1, 1], [], []>} : vector<16x32xbf16>, vector<32x16xbf16>, vector<16x16xf32> -> vector<16x16xf32>
    %291 = vector.extract_strided_slice %0 {offsets = [16, 0], sizes = [1, 16], strides = [1, 1]} : vector<40x128xf32> to vector<1x16xf32>
    %292 = vector.broadcast %291 : vector<1x16xf32> to vector<16x16xf32>
    %293 = arith.addf %290, %292 : vector<16x16xf32>
    %cst_106 = arith.constant 2.500000e-01 : f32
    %294 = vector.broadcast %cst_106 : f32 to vector<16x16xf32>
    %295 = arith.mulf %293, %294 : vector<16x16xf32>
    %cst_107 = arith.constant dense<0.000000e+00> : vector<16x16xf32>
    %296 = tpu.matmul %260, %287, %cst_107 {dimension_numbers = #tpu.dot_dimension_numbers<[1], [0], [0], [1], [0, 0, 1, 1], [], []>} : vector<16x32xbf16>, vector<32x16xbf16>, vector<16x16xf32> -> vector<16x16xf32>
    %297 = vector.extract_strided_slice %0 {offsets = [18, 0], sizes = [1, 16], strides = [1, 1]} : vector<40x128xf32> to vector<1x16xf32>
    %298 = vector.broadcast %297 : vector<1x16xf32> to vector<16x16xf32>
    %299 = arith.addf %296, %298 : vector<16x16xf32>
    %cst_108 = arith.constant dense<0.000000e+00> : vector<16x16xf32>
    %300 = tpu.matmul %260, %289, %cst_108 {dimension_numbers = #tpu.dot_dimension_numbers<[1], [0], [0], [1], [0, 0, 1, 1], [], []>} : vector<16x32xbf16>, vector<32x16xbf16>, vector<16x16xf32> -> vector<16x16xf32>
    %301 = vector.extract_strided_slice %0 {offsets = [20, 0], sizes = [1, 16], strides = [1, 1]} : vector<40x128xf32> to vector<1x16xf32>
    %302 = vector.broadcast %301 : vector<1x16xf32> to vector<16x16xf32>
    %303 = arith.addf %300, %302 : vector<16x16xf32>
    %304 = arith.truncf %295 : vector<16x16xf32> to vector<16x16xbf16>
    %305 = arith.truncf %299 : vector<16x16xf32> to vector<16x16xbf16>
    %306 = arith.truncf %303 : vector<16x16xf32> to vector<16x16xbf16>
    %307 = vector.extract_strided_slice %39 {offsets = [0, 0], sizes = [1, 8], strides = [1, 1]} : vector<2x8xf32> to vector<1x8xf32>
    %308 = vector.extract_strided_slice %281 {offsets = [0, 0], sizes = [8, 16], strides = [1, 1]} : vector<16x16xbf16> to vector<8x16xbf16>
    %309 = vector.extract_strided_slice %282 {offsets = [0, 0], sizes = [8, 16], strides = [1, 1]} : vector<16x16xbf16> to vector<8x16xbf16>
    %310 = vector.extract_strided_slice %283 {offsets = [0, 0], sizes = [8, 16], strides = [1, 1]} : vector<16x16xbf16> to vector<8x16xbf16>
    %cst_109 = arith.constant dense<0.000000e+00> : vector<8x8xf32>
    %311 = tpu.matmul %308, %309, %cst_109 {dimension_numbers = #tpu.dot_dimension_numbers<[1], [1], [0], [0], [0, 0, 1, 0], [], []>} : vector<8x16xbf16>, vector<8x16xbf16>, vector<8x8xf32> -> vector<8x8xf32>
    %312 = vector.broadcast %307 : vector<1x8xf32> to vector<8x8xf32>
    %313 = arith.addf %311, %312 : vector<8x8xf32>
    %cst_110 = arith.constant dense<0xFF800000> : vector<8xf32>
    %314 = vector.multi_reduction <maximumf>, %313, %cst_110 [1] : vector<8x8xf32> to vector<8xf32>
    %315 = vector.shape_cast %314 : vector<8xf32> to vector<8x1xf32>
    %316 = vector.broadcast %315 : vector<8x1xf32> to vector<8x8xf32>
    %317 = arith.subf %313, %316 : vector<8x8xf32>
    %318 = math.exp %317 : vector<8x8xf32>
    %cst_111 = arith.constant dense<0.000000e+00> : vector<8xf32>
    %319 = vector.multi_reduction <add>, %318, %cst_111 [1] : vector<8x8xf32> to vector<8xf32>
    %320 = vector.shape_cast %319 : vector<8xf32> to vector<8x1xf32>
    %321 = arith.truncf %318 : vector<8x8xf32> to vector<8x8xbf16>
    %cst_112 = arith.constant dense<0.000000e+00> : vector<8x16xf32>
    %322 = tpu.matmul %321, %310, %cst_112 {dimension_numbers = #tpu.dot_dimension_numbers<[1], [0], [0], [1], [0, 0, 1, 1], [], []>} : vector<8x8xbf16>, vector<8x16xbf16>, vector<8x16xf32> -> vector<8x16xf32>
    %323 = tpu.reciprocal %320 {approx = true} : vector<8x1xf32> -> vector<8x1xf32>
    %324 = vector.broadcast %323 : vector<8x1xf32> to vector<8x16xf32>
    %325 = arith.mulf %322, %324 : vector<8x16xf32>
    %326 = arith.truncf %325 : vector<8x16xf32> to vector<8x16xbf16>
    %c2_113 = arith.constant 2 : index
    %c0_114 = arith.constant 0 : index
    %c0_115 = arith.constant 0 : index
    %327 = vector.load %arg6[%c2_113, %c0_114, %c0_115] : memref<4x16x32xbf16, #tpu.memory_space<vmem>>, vector<1x16x32xbf16>
    %328 = vector.shape_cast %327 : vector<1x16x32xbf16> to vector<16x32xbf16>
    %cst_116 = arith.constant dense<0.000000e+00> : vector<8x32xf32>
    %329 = tpu.matmul %326, %328, %cst_116 {dimension_numbers = #tpu.dot_dimension_numbers<[1], [0], [0], [1], [0, 0, 1, 1], [], []>} : vector<8x16xbf16>, vector<16x32xbf16>, vector<8x32xf32> -> vector<8x32xf32>
    %330 = vector.extract_strided_slice %304 {offsets = [0, 0], sizes = [8, 16], strides = [1, 1]} : vector<16x16xbf16> to vector<8x16xbf16>
    %331 = vector.extract_strided_slice %305 {offsets = [0, 0], sizes = [8, 16], strides = [1, 1]} : vector<16x16xbf16> to vector<8x16xbf16>
    %332 = vector.extract_strided_slice %306 {offsets = [0, 0], sizes = [8, 16], strides = [1, 1]} : vector<16x16xbf16> to vector<8x16xbf16>
    %cst_117 = arith.constant dense<0.000000e+00> : vector<8x8xf32>
    %333 = tpu.matmul %330, %331, %cst_117 {dimension_numbers = #tpu.dot_dimension_numbers<[1], [1], [0], [0], [0, 0, 1, 0], [], []>} : vector<8x16xbf16>, vector<8x16xbf16>, vector<8x8xf32> -> vector<8x8xf32>
    %334 = vector.broadcast %307 : vector<1x8xf32> to vector<8x8xf32>
    %335 = arith.addf %333, %334 : vector<8x8xf32>
    %cst_118 = arith.constant dense<0xFF800000> : vector<8xf32>
    %336 = vector.multi_reduction <maximumf>, %335, %cst_118 [1] : vector<8x8xf32> to vector<8xf32>
    %337 = vector.shape_cast %336 : vector<8xf32> to vector<8x1xf32>
    %338 = vector.broadcast %337 : vector<8x1xf32> to vector<8x8xf32>
    %339 = arith.subf %335, %338 : vector<8x8xf32>
    %340 = math.exp %339 : vector<8x8xf32>
    %cst_119 = arith.constant dense<0.000000e+00> : vector<8xf32>
    %341 = vector.multi_reduction <add>, %340, %cst_119 [1] : vector<8x8xf32> to vector<8xf32>
    %342 = vector.shape_cast %341 : vector<8xf32> to vector<8x1xf32>
    %343 = arith.truncf %340 : vector<8x8xf32> to vector<8x8xbf16>
    %cst_120 = arith.constant dense<0.000000e+00> : vector<8x16xf32>
    %344 = tpu.matmul %343, %332, %cst_120 {dimension_numbers = #tpu.dot_dimension_numbers<[1], [0], [0], [1], [0, 0, 1, 1], [], []>} : vector<8x8xbf16>, vector<8x16xbf16>, vector<8x16xf32> -> vector<8x16xf32>
    %345 = tpu.reciprocal %342 {approx = true} : vector<8x1xf32> -> vector<8x1xf32>
    %346 = vector.broadcast %345 : vector<8x1xf32> to vector<8x16xf32>
    %347 = arith.mulf %344, %346 : vector<8x16xf32>
    %348 = arith.truncf %347 : vector<8x16xf32> to vector<8x16xbf16>
    %c3_121 = arith.constant 3 : index
    %c0_122 = arith.constant 0 : index
    %c0_123 = arith.constant 0 : index
    %349 = vector.load %arg6[%c3_121, %c0_122, %c0_123] : memref<4x16x32xbf16, #tpu.memory_space<vmem>>, vector<1x16x32xbf16>
    %350 = vector.shape_cast %349 : vector<1x16x32xbf16> to vector<16x32xbf16>
    %cst_124 = arith.constant dense<0.000000e+00> : vector<8x32xf32>
    %351 = tpu.matmul %348, %350, %cst_124 {dimension_numbers = #tpu.dot_dimension_numbers<[1], [0], [0], [1], [0, 0, 1, 1], [], []>} : vector<8x16xbf16>, vector<16x32xbf16>, vector<8x32xf32> -> vector<8x32xf32>
    %352 = arith.addf %329, %351 : vector<8x32xf32>
    %353 = vector.extract_strided_slice %39 {offsets = [1, 0], sizes = [1, 8], strides = [1, 1]} : vector<2x8xf32> to vector<1x8xf32>
    %354 = vector.extract_strided_slice %281 {offsets = [8, 0], sizes = [8, 16], strides = [1, 1]} : vector<16x16xbf16> to vector<8x16xbf16>
    %355 = vector.extract_strided_slice %282 {offsets = [8, 0], sizes = [8, 16], strides = [1, 1]} : vector<16x16xbf16> to vector<8x16xbf16>
    %356 = vector.extract_strided_slice %283 {offsets = [8, 0], sizes = [8, 16], strides = [1, 1]} : vector<16x16xbf16> to vector<8x16xbf16>
    %cst_125 = arith.constant dense<0.000000e+00> : vector<8x8xf32>
    %357 = tpu.matmul %354, %355, %cst_125 {dimension_numbers = #tpu.dot_dimension_numbers<[1], [1], [0], [0], [0, 0, 1, 0], [], []>} : vector<8x16xbf16>, vector<8x16xbf16>, vector<8x8xf32> -> vector<8x8xf32>
    %358 = vector.broadcast %353 : vector<1x8xf32> to vector<8x8xf32>
    %359 = arith.addf %357, %358 : vector<8x8xf32>
    %cst_126 = arith.constant dense<0xFF800000> : vector<8xf32>
    %360 = vector.multi_reduction <maximumf>, %359, %cst_126 [1] : vector<8x8xf32> to vector<8xf32>
    %361 = vector.shape_cast %360 : vector<8xf32> to vector<8x1xf32>
    %362 = vector.broadcast %361 : vector<8x1xf32> to vector<8x8xf32>
    %363 = arith.subf %359, %362 : vector<8x8xf32>
    %364 = math.exp %363 : vector<8x8xf32>
    %cst_127 = arith.constant dense<0.000000e+00> : vector<8xf32>
    %365 = vector.multi_reduction <add>, %364, %cst_127 [1] : vector<8x8xf32> to vector<8xf32>
    %366 = vector.shape_cast %365 : vector<8xf32> to vector<8x1xf32>
    %367 = arith.truncf %364 : vector<8x8xf32> to vector<8x8xbf16>
    %cst_128 = arith.constant dense<0.000000e+00> : vector<8x16xf32>
    %368 = tpu.matmul %367, %356, %cst_128 {dimension_numbers = #tpu.dot_dimension_numbers<[1], [0], [0], [1], [0, 0, 1, 1], [], []>} : vector<8x8xbf16>, vector<8x16xbf16>, vector<8x16xf32> -> vector<8x16xf32>
    %369 = tpu.reciprocal %366 {approx = true} : vector<8x1xf32> -> vector<8x1xf32>
    %370 = vector.broadcast %369 : vector<8x1xf32> to vector<8x16xf32>
    %371 = arith.mulf %368, %370 : vector<8x16xf32>
    %372 = arith.truncf %371 : vector<8x16xf32> to vector<8x16xbf16>
    %c2_129 = arith.constant 2 : index
    %c0_130 = arith.constant 0 : index
    %c0_131 = arith.constant 0 : index
    %373 = vector.load %arg6[%c2_129, %c0_130, %c0_131] : memref<4x16x32xbf16, #tpu.memory_space<vmem>>, vector<1x16x32xbf16>
    %374 = vector.shape_cast %373 : vector<1x16x32xbf16> to vector<16x32xbf16>
    %cst_132 = arith.constant dense<0.000000e+00> : vector<8x32xf32>
    %375 = tpu.matmul %372, %374, %cst_132 {dimension_numbers = #tpu.dot_dimension_numbers<[1], [0], [0], [1], [0, 0, 1, 1], [], []>} : vector<8x16xbf16>, vector<16x32xbf16>, vector<8x32xf32> -> vector<8x32xf32>
    %376 = vector.extract_strided_slice %304 {offsets = [8, 0], sizes = [8, 16], strides = [1, 1]} : vector<16x16xbf16> to vector<8x16xbf16>
    %377 = vector.extract_strided_slice %305 {offsets = [8, 0], sizes = [8, 16], strides = [1, 1]} : vector<16x16xbf16> to vector<8x16xbf16>
    %378 = vector.extract_strided_slice %306 {offsets = [8, 0], sizes = [8, 16], strides = [1, 1]} : vector<16x16xbf16> to vector<8x16xbf16>
    %cst_133 = arith.constant dense<0.000000e+00> : vector<8x8xf32>
    %379 = tpu.matmul %376, %377, %cst_133 {dimension_numbers = #tpu.dot_dimension_numbers<[1], [1], [0], [0], [0, 0, 1, 0], [], []>} : vector<8x16xbf16>, vector<8x16xbf16>, vector<8x8xf32> -> vector<8x8xf32>
    %380 = vector.broadcast %353 : vector<1x8xf32> to vector<8x8xf32>
    %381 = arith.addf %379, %380 : vector<8x8xf32>
    %cst_134 = arith.constant dense<0xFF800000> : vector<8xf32>
    %382 = vector.multi_reduction <maximumf>, %381, %cst_134 [1] : vector<8x8xf32> to vector<8xf32>
    %383 = vector.shape_cast %382 : vector<8xf32> to vector<8x1xf32>
    %384 = vector.broadcast %383 : vector<8x1xf32> to vector<8x8xf32>
    %385 = arith.subf %381, %384 : vector<8x8xf32>
    %386 = math.exp %385 : vector<8x8xf32>
    %cst_135 = arith.constant dense<0.000000e+00> : vector<8xf32>
    %387 = vector.multi_reduction <add>, %386, %cst_135 [1] : vector<8x8xf32> to vector<8xf32>
    %388 = vector.shape_cast %387 : vector<8xf32> to vector<8x1xf32>
    %389 = arith.truncf %386 : vector<8x8xf32> to vector<8x8xbf16>
    %cst_136 = arith.constant dense<0.000000e+00> : vector<8x16xf32>
    %390 = tpu.matmul %389, %378, %cst_136 {dimension_numbers = #tpu.dot_dimension_numbers<[1], [0], [0], [1], [0, 0, 1, 1], [], []>} : vector<8x8xbf16>, vector<8x16xbf16>, vector<8x16xf32> -> vector<8x16xf32>
    %391 = tpu.reciprocal %388 {approx = true} : vector<8x1xf32> -> vector<8x1xf32>
    %392 = vector.broadcast %391 : vector<8x1xf32> to vector<8x16xf32>
    %393 = arith.mulf %390, %392 : vector<8x16xf32>
    %394 = arith.truncf %393 : vector<8x16xf32> to vector<8x16xbf16>
    %c3_137 = arith.constant 3 : index
    %c0_138 = arith.constant 0 : index
    %c0_139 = arith.constant 0 : index
    %395 = vector.load %arg6[%c3_137, %c0_138, %c0_139] : memref<4x16x32xbf16, #tpu.memory_space<vmem>>, vector<1x16x32xbf16>
    %396 = vector.shape_cast %395 : vector<1x16x32xbf16> to vector<16x32xbf16>
    %cst_140 = arith.constant dense<0.000000e+00> : vector<8x32xf32>
    %397 = tpu.matmul %394, %396, %cst_140 {dimension_numbers = #tpu.dot_dimension_numbers<[1], [0], [0], [1], [0, 0, 1, 1], [], []>} : vector<8x16xbf16>, vector<16x32xbf16>, vector<8x32xf32> -> vector<8x32xf32>
    %398 = arith.addf %375, %397 : vector<8x32xf32>
    %399 = tpu.concatenate %352, %398 in 0 : vector<8x32xf32>, vector<8x32xf32> -> vector<16x32xf32>
    %400 = vector.extract_strided_slice %0 {offsets = [21, 0], sizes = [1, 32], strides = [1, 1]} : vector<40x128xf32> to vector<1x32xf32>
    %401 = vector.broadcast %400 : vector<1x32xf32> to vector<16x32xf32>
    %402 = arith.addf %399, %401 : vector<16x32xf32>
    %403 = arith.addf %402, %259 : vector<16x32xf32>
    %404 = vector.extract_strided_slice %0 {offsets = [22, 0], sizes = [1, 32], strides = [1, 1]} : vector<40x128xf32> to vector<1x32xf32>
    %405 = vector.extract_strided_slice %0 {offsets = [23, 0], sizes = [1, 32], strides = [1, 1]} : vector<40x128xf32> to vector<1x32xf32>
    %cst_141 = arith.constant dense<0.000000e+00> : vector<16xf32>
    %406 = vector.multi_reduction <add>, %403, %cst_141 [1] : vector<16x32xf32> to vector<16xf32>
    %407 = vector.shape_cast %406 : vector<16xf32> to vector<16x1xf32>
    %cst_142 = arith.constant 3.200000e+01 : f32
    %408 = vector.broadcast %cst_142 : f32 to vector<16x1xf32>
    %409 = arith.divf %407, %408 : vector<16x1xf32>
    %410 = vector.broadcast %409 : vector<16x1xf32> to vector<16x32xf32>
    %411 = arith.subf %403, %410 : vector<16x32xf32>
    %412 = arith.mulf %411, %411 : vector<16x32xf32>
    %cst_143 = arith.constant dense<0.000000e+00> : vector<16xf32>
    %413 = vector.multi_reduction <add>, %412, %cst_143 [1] : vector<16x32xf32> to vector<16xf32>
    %414 = vector.shape_cast %413 : vector<16xf32> to vector<16x1xf32>
    %cst_144 = arith.constant 3.200000e+01 : f32
    %415 = vector.broadcast %cst_144 : f32 to vector<16x1xf32>
    %416 = arith.divf %414, %415 : vector<16x1xf32>
    %417 = vector.broadcast %409 : vector<16x1xf32> to vector<16x32xf32>
    %418 = arith.subf %403, %417 : vector<16x32xf32>
    %cst_145 = arith.constant 9.99999996E-13 : f32
    %419 = vector.broadcast %cst_145 : f32 to vector<16x1xf32>
    %420 = arith.addf %416, %419 : vector<16x1xf32>
    %421 = math.rsqrt %420 : vector<16x1xf32>
    %422 = vector.broadcast %421 : vector<16x1xf32> to vector<16x32xf32>
    %423 = arith.mulf %418, %422 : vector<16x32xf32>
    %424 = vector.broadcast %404 : vector<1x32xf32> to vector<16x32xf32>
    %425 = arith.mulf %423, %424 : vector<16x32xf32>
    %426 = vector.broadcast %405 : vector<1x32xf32> to vector<16x32xf32>
    %427 = arith.addf %425, %426 : vector<16x32xf32>
    %428 = arith.truncf %427 : vector<16x32xf32> to vector<16x32xbf16>
    %c1_146 = arith.constant 1 : index
    %c0_147 = arith.constant 0 : index
    %c0_148 = arith.constant 0 : index
    %429 = vector.load %arg7[%c1_146, %c0_147, %c0_148] : memref<2x32x64xbf16, #tpu.memory_space<vmem>>, vector<1x32x64xbf16>
    %430 = vector.shape_cast %429 : vector<1x32x64xbf16> to vector<32x64xbf16>
    %cst_149 = arith.constant dense<0.000000e+00> : vector<16x64xf32>
    %431 = tpu.matmul %428, %430, %cst_149 {dimension_numbers = #tpu.dot_dimension_numbers<[1], [0], [0], [1], [0, 0, 1, 1], [], []>} : vector<16x32xbf16>, vector<32x64xbf16>, vector<16x64xf32> -> vector<16x64xf32>
    %432 = vector.extract_strided_slice %0 {offsets = [24, 0], sizes = [1, 64], strides = [1, 1]} : vector<40x128xf32> to vector<1x64xf32>
    %433 = vector.broadcast %432 : vector<1x64xf32> to vector<16x64xf32>
    %434 = arith.addf %431, %433 : vector<16x64xf32>
    %435 = arith.mulf %434, %434 : vector<16x64xf32>
    %436 = arith.mulf %434, %435 : vector<16x64xf32>
    %cst_150 = arith.constant 4.471500e-02 : f32
    %437 = vector.broadcast %cst_150 : f32 to vector<16x64xf32>
    %438 = arith.mulf %437, %436 : vector<16x64xf32>
    %439 = arith.addf %434, %438 : vector<16x64xf32>
    %cst_151 = arith.constant 0.797884583 : f32
    %440 = vector.broadcast %cst_151 : f32 to vector<16x64xf32>
    %441 = arith.mulf %440, %439 : vector<16x64xf32>
    %442 = math.tanh %441 : vector<16x64xf32>
    %cst_152 = arith.constant 1.000000e+00 : f32
    %443 = vector.broadcast %cst_152 : f32 to vector<16x64xf32>
    %444 = arith.addf %443, %442 : vector<16x64xf32>
    %cst_153 = arith.constant 5.000000e-01 : f32
    %445 = vector.broadcast %cst_153 : f32 to vector<16x64xf32>
    %446 = arith.mulf %445, %444 : vector<16x64xf32>
    %447 = arith.mulf %434, %446 : vector<16x64xf32>
    %448 = arith.truncf %447 : vector<16x64xf32> to vector<16x64xbf16>
    %c1_154 = arith.constant 1 : index
    %c0_155 = arith.constant 0 : index
    %c0_156 = arith.constant 0 : index
    %449 = vector.load %arg8[%c1_154, %c0_155, %c0_156] : memref<2x64x32xbf16, #tpu.memory_space<vmem>>, vector<1x64x32xbf16>
    %450 = vector.shape_cast %449 : vector<1x64x32xbf16> to vector<64x32xbf16>
    %cst_157 = arith.constant dense<0.000000e+00> : vector<16x32xf32>
    %451 = tpu.matmul %448, %450, %cst_157 {dimension_numbers = #tpu.dot_dimension_numbers<[1], [0], [0], [1], [0, 0, 1, 1], [], []>} : vector<16x64xbf16>, vector<64x32xbf16>, vector<16x32xf32> -> vector<16x32xf32>
    %452 = vector.extract_strided_slice %0 {offsets = [25, 0], sizes = [1, 32], strides = [1, 1]} : vector<40x128xf32> to vector<1x32xf32>
    %453 = vector.broadcast %452 : vector<1x32xf32> to vector<16x32xf32>
    %454 = arith.addf %451, %453 : vector<16x32xf32>
    %455 = arith.addf %454, %427 : vector<16x32xf32>
    %456 = vector.extract_strided_slice %0 {offsets = [26, 0], sizes = [1, 32], strides = [1, 1]} : vector<40x128xf32> to vector<1x32xf32>
    %457 = vector.extract_strided_slice %0 {offsets = [27, 0], sizes = [1, 32], strides = [1, 1]} : vector<40x128xf32> to vector<1x32xf32>
    %cst_158 = arith.constant dense<0.000000e+00> : vector<16xf32>
    %458 = vector.multi_reduction <add>, %455, %cst_158 [1] : vector<16x32xf32> to vector<16xf32>
    %459 = vector.shape_cast %458 : vector<16xf32> to vector<16x1xf32>
    %cst_159 = arith.constant 3.200000e+01 : f32
    %460 = vector.broadcast %cst_159 : f32 to vector<16x1xf32>
    %461 = arith.divf %459, %460 : vector<16x1xf32>
    %462 = vector.broadcast %461 : vector<16x1xf32> to vector<16x32xf32>
    %463 = arith.subf %455, %462 : vector<16x32xf32>
    %464 = arith.mulf %463, %463 : vector<16x32xf32>
    %cst_160 = arith.constant dense<0.000000e+00> : vector<16xf32>
    %465 = vector.multi_reduction <add>, %464, %cst_160 [1] : vector<16x32xf32> to vector<16xf32>
    %466 = vector.shape_cast %465 : vector<16xf32> to vector<16x1xf32>
    %cst_161 = arith.constant 3.200000e+01 : f32
    %467 = vector.broadcast %cst_161 : f32 to vector<16x1xf32>
    %468 = arith.divf %466, %467 : vector<16x1xf32>
    %469 = vector.broadcast %461 : vector<16x1xf32> to vector<16x32xf32>
    %470 = arith.subf %455, %469 : vector<16x32xf32>
    %cst_162 = arith.constant 9.99999996E-13 : f32
    %471 = vector.broadcast %cst_162 : f32 to vector<16x1xf32>
    %472 = arith.addf %468, %471 : vector<16x1xf32>
    %473 = math.rsqrt %472 : vector<16x1xf32>
    %474 = vector.broadcast %473 : vector<16x1xf32> to vector<16x32xf32>
    %475 = arith.mulf %470, %474 : vector<16x32xf32>
    %476 = vector.broadcast %456 : vector<1x32xf32> to vector<16x32xf32>
    %477 = arith.mulf %475, %476 : vector<16x32xf32>
    %478 = vector.broadcast %457 : vector<1x32xf32> to vector<16x32xf32>
    %479 = arith.addf %477, %478 : vector<16x32xf32>
    %480 = vector.shape_cast %479 : vector<16x32xf32> to vector<2x8x32xf32>
    %481 = vector.extract_strided_slice %480 {offsets = [0, 0, 0], sizes = [2, 1, 32], strides = [1, 1, 1]} : vector<2x8x32xf32> to vector<2x1x32xf32>
    %482 = vector.shape_cast %481 : vector<2x1x32xf32> to vector<2x32xf32>
    %c0_163 = arith.constant 0 : index
    %c0_164 = arith.constant 0 : index
    %483 = vector.load %arg9[%c0_163, %c0_164] : memref<32x32xf32, #tpu.memory_space<vmem>>, vector<32x32xf32>
    %cst_165 = arith.constant dense<0.000000e+00> : vector<2x32xf32>
    %484 = tpu.matmul %482, %483, %cst_165 {dimension_numbers = #tpu.dot_dimension_numbers<[1], [0], [0], [1], [0, 0, 1, 1], [], []>} : vector<2x32xf32>, vector<32x32xf32>, vector<2x32xf32> -> vector<2x32xf32>
    %485 = vector.extract_strided_slice %0 {offsets = [28, 0], sizes = [1, 32], strides = [1, 1]} : vector<40x128xf32> to vector<1x32xf32>
    %486 = vector.broadcast %485 : vector<1x32xf32> to vector<2x32xf32>
    %487 = arith.addf %484, %486 : vector<2x32xf32>
    %488 = vector.extract_strided_slice %0 {offsets = [31, 0], sizes = [1, 32], strides = [1, 1]} : vector<40x128xf32> to vector<1x32xf32>
    %489 = vector.broadcast %488 : vector<1x32xf32> to vector<2x32xf32>
    %490 = arith.subf %487, %489 : vector<2x32xf32>
    %491 = vector.extract_strided_slice %0 {offsets = [32, 0], sizes = [1, 32], strides = [1, 1]} : vector<40x128xf32> to vector<1x32xf32>
    %cst_166 = arith.constant 9.99999974E-6 : f32
    %492 = vector.broadcast %cst_166 : f32 to vector<1x32xf32>
    %493 = arith.addf %491, %492 : vector<1x32xf32>
    %494 = math.rsqrt %493 : vector<1x32xf32>
    %495 = vector.broadcast %494 : vector<1x32xf32> to vector<2x32xf32>
    %496 = arith.mulf %490, %495 : vector<2x32xf32>
    %497 = vector.extract_strided_slice %0 {offsets = [29, 0], sizes = [1, 32], strides = [1, 1]} : vector<40x128xf32> to vector<1x32xf32>
    %498 = vector.broadcast %497 : vector<1x32xf32> to vector<2x32xf32>
    %499 = arith.mulf %496, %498 : vector<2x32xf32>
    %500 = vector.extract_strided_slice %0 {offsets = [30, 0], sizes = [1, 32], strides = [1, 1]} : vector<40x128xf32> to vector<1x32xf32>
    %501 = vector.broadcast %500 : vector<1x32xf32> to vector<2x32xf32>
    %502 = arith.addf %499, %501 : vector<2x32xf32>
    %cst_167 = arith.constant 0.000000e+00 : f32
    %503 = vector.broadcast %cst_167 : f32 to vector<2x32xf32>
    %504 = arith.maximumf %502, %503 : vector<2x32xf32>
    %c0_168 = arith.constant 0 : index
    %c0_169 = arith.constant 0 : index
    %505 = vector.load %arg10[%c0_168, %c0_169] : memref<32x16xf32, #tpu.memory_space<vmem>>, vector<32x16xf32>
    %cst_170 = arith.constant dense<0.000000e+00> : vector<2x16xf32>
    %506 = tpu.matmul %504, %505, %cst_170 {dimension_numbers = #tpu.dot_dimension_numbers<[1], [0], [0], [1], [0, 0, 1, 1], [], []>} : vector<2x32xf32>, vector<32x16xf32>, vector<2x16xf32> -> vector<2x16xf32>
    %507 = vector.extract_strided_slice %0 {offsets = [33, 0], sizes = [1, 16], strides = [1, 1]} : vector<40x128xf32> to vector<1x16xf32>
    %508 = vector.broadcast %507 : vector<1x16xf32> to vector<2x16xf32>
    %509 = arith.addf %506, %508 : vector<2x16xf32>
    %510 = vector.extract_strided_slice %0 {offsets = [34, 0], sizes = [1, 16], strides = [1, 1]} : vector<40x128xf32> to vector<1x16xf32>
    %511 = vector.extract_strided_slice %0 {offsets = [35, 0], sizes = [1, 16], strides = [1, 1]} : vector<40x128xf32> to vector<1x16xf32>
    %cst_171 = arith.constant dense<0.000000e+00> : vector<2xf32>
    %512 = vector.multi_reduction <add>, %509, %cst_171 [1] : vector<2x16xf32> to vector<2xf32>
    %513 = vector.shape_cast %512 : vector<2xf32> to vector<2x1xf32>
    %cst_172 = arith.constant 1.600000e+01 : f32
    %514 = vector.broadcast %cst_172 : f32 to vector<2x1xf32>
    %515 = arith.divf %513, %514 : vector<2x1xf32>
    %516 = vector.broadcast %515 : vector<2x1xf32> to vector<2x16xf32>
    %517 = arith.subf %509, %516 : vector<2x16xf32>
    %518 = arith.mulf %517, %517 : vector<2x16xf32>
    %cst_173 = arith.constant dense<0.000000e+00> : vector<2xf32>
    %519 = vector.multi_reduction <add>, %518, %cst_173 [1] : vector<2x16xf32> to vector<2xf32>
    %520 = vector.shape_cast %519 : vector<2xf32> to vector<2x1xf32>
    %cst_174 = arith.constant 1.600000e+01 : f32
    %521 = vector.broadcast %cst_174 : f32 to vector<2x1xf32>
    %522 = arith.divf %520, %521 : vector<2x1xf32>
    %523 = vector.broadcast %515 : vector<2x1xf32> to vector<2x16xf32>
    %524 = arith.subf %509, %523 : vector<2x16xf32>
    %cst_175 = arith.constant 9.99999974E-6 : f32
    %525 = vector.broadcast %cst_175 : f32 to vector<2x1xf32>
    %526 = arith.addf %522, %525 : vector<2x1xf32>
    %527 = math.rsqrt %526 : vector<2x1xf32>
    %528 = vector.broadcast %527 : vector<2x1xf32> to vector<2x16xf32>
    %529 = arith.mulf %524, %528 : vector<2x16xf32>
    %530 = vector.broadcast %510 : vector<1x16xf32> to vector<2x16xf32>
    %531 = arith.mulf %529, %530 : vector<2x16xf32>
    %532 = vector.broadcast %511 : vector<1x16xf32> to vector<2x16xf32>
    %533 = arith.addf %531, %532 : vector<2x16xf32>
    %c0_176 = arith.constant 0 : index
    %c0_177 = arith.constant 0 : index
    %534 = vector.load %arg11[%c0_176, %c0_177] : memref<2x16xf32, #tpu.memory_space<vmem>>, vector<2x16xf32>
    tpu.vector_store %arg11[%c0_176, %c0_177], %533 {strides = array<i32>} : memref<2x16xf32, #tpu.memory_space<vmem>>, vector<2x16xf32>,
    return
  }
}

</mosaic_0001>

<bundles_post_ra>
// kernel: text_encoder.1
= control target key start
LH: loop header
LB: loop body
LE: loop exit
PB: predicated region body
PF: predicated region fallthrough
CT: control target
= control target key end

     0   :  { %vm81_vm0 = vcmask 1043456   ;;  %v3696_v2 = vmov 0   ;;  %v3697_v6 = vmov 0.0   ;;  %s4418_s0 = inlined_call_operand.vmem [shape: s32[16,1], index: 0, kind: input, shape index: {}]   ;;  %s4419_s1 = inlined_call_operand.vmem [shape: f32[2,8], index: 1, kind: input, shape index: {}]   ;;  %s4420_s2 = inlined_call_operand.vmem [shape: f32[40,128], index: 2, kind: input, shape index: {}]   ;;  %s4421_s3 = inlined_call_operand.vmem [shape: f32[100,32], index: 3, kind: input, shape index: {}]   ;;  %s4422_s4 = inlined_call_operand.vmem [shape: f32[16,32], index: 4, kind: input, shape index: {}]   ;;  %s4423_s5 = inlined_call_operand.vmem [shape: bf16[12,32,16], index: 5, kind: input, shape index: {}]   ;;  %s4424_s6 = inlined_call_operand.vmem [shape: bf16[4,16,32], index: 6, kind: input, shape index: {}]   ;;  %s4425_s7 = inlined_call_operand.vmem [shape: bf16[2,32,64], index: 7, kind: input, shape index: {}]   ;;  %s4426_s8 = inlined_call_operand.vmem [shape: bf16[2,64,32], index: 8, kind: input, shape index: {}]   ;;  %s4427_s9 = inlined_call_operand.vmem [shape: f32[32,32], index: 9, kind: input, shape index: {}]   ;;  %s4428_s10 = inlined_call_operand.vmem [shape: f32[32,16], index: 10, kind: input, shape index: {}]   ;;  %s4429_s11 = inlined_call_operand.hbm [shape: f32[2,16], index: 11, kind: output, shape index: {}]  }
   0x1   :  { %v45_v0 = vld [vmem:[%s4418_s0] sm:$0xff]  ;;  %3569 = vset.pattern.permute.xlu0 %v3696_v2  ;;  %v72_v3 = vld [vmem:[%s4421_s3 + $0x58] sm:$0xff]  ;;  %v71_v4 = vld [vmem:[%s4421_s3 + $0x50] sm:$0xff]  ;;  %3263 = vmatprep.subr.bf16.mxu1 %v3697_v6 }
   0x2   :  { %v73_v1 = vld [vmem:[%s4421_s3 + $0x60] sm:$0xf]  ;;  %50 = vperm.xlu0 %3569, %v45_v0   ;;  %v46_v5 = vld [vmem:[%s4418_s0 + $0x8] sm:$0xff]  ;;  %v68_v9 = vld [vmem:[%s4421_s3 + $0x38] sm:$0xff] }
   0x3   :  { %3234 = vmatprep.subr.msk.mxu0 %vm81_vm0, %v73_v1  ;;  %v70_v7 = vld [vmem:[%s4421_s3 + $0x48] sm:$0xff]  ;;  %v69_v8 = vld [vmem:[%s4421_s3 + $0x40] sm:$0xff]  ;;  %v67_v10 = vld [vmem:[%s4421_s3 + $0x30] sm:$0xff] }
   0x4   :  { %3235 = vmatpush3.msk.msra.mxu0 %vm81_vm0, %v73_v1  ;;  %v66_v11 = vld [vmem:[%s4421_s3 + $0x28] sm:$0xff]  ;;  %v65_v12 = vld [vmem:[%s4421_s3 + $0x20] sm:$0xff]  ;;  %v64_v13 = vld [vmem:[%s4421_s3 + $0x18] sm:$0xff] }
   0x5   :  { %3236 = vmatprep.subr.mxu0 %v72_v3  ;;  %v63_v14 = vld [vmem:[%s4421_s3 + $0x10] sm:$0xff]  ;;  %v62_v15 = vld [vmem:[%s4421_s3 + $0x8] sm:$0xff]  ;;  %v61_v16 = vld [vmem:[%s4421_s3] sm:$0xff] }
   0x6   :  { %3237 = vmatpush3.msra.mxu0 %v72_v3  ;;  %53 = vperm.xlu0 %3569, %v46_v5  }
   0x7   :  { %3238 = vmatprep.subr.mxu0 %v71_v4 }
   0x8   :  { %3239 = vmatpush3.msra.mxu0 %v71_v4 }
   0x9   :  { %3240 = vmatprep.subr.mxu0 %v70_v7 }
   0xa   :  { %3241 = vmatpush3.msra.mxu0 %v70_v7 }
   0xb   :  { %3242 = vmatprep.subr.mxu0 %v69_v8 }
   0xc   :  { %3243 = vmatpush3.msra.mxu0 %v69_v8 }
   0xd   :  { %3244 = vmatprep.subr.mxu0 %v68_v9 }
   0xe   :  { %3245 = vmatpush3.msra.mxu0 %v68_v9 }
   0xf   :  { %3246 = vmatprep.subr.mxu0 %v67_v10 }
  0x10   :  { %3247 = vmatpush3.msra.mxu0 %v67_v10 }
  0x11   :  { %3248 = vmatprep.subr.mxu0 %v66_v11 }
  0x12   :  { %3249 = vmatpush3.msra.mxu0 %v66_v11 }
  0x13   :  { %3250 = vmatprep.subr.mxu0 %v65_v12 }
  0x14   :  { %3251 = vmatpush3.msra.mxu0 %v65_v12 }
  0x15   :  { %3252 = vmatprep.subr.mxu0 %v64_v13 }
  0x16   :  { %3253 = vmatpush3.msra.mxu0 %v64_v13 }
  0x17   :  { %3254 = vmatprep.subr.mxu0 %v63_v14 }
  0x18   :  { %3255 = vmatpush3.msra.mxu0 %v63_v14 }
  0x19   :  { %3256 = vmatprep.subr.mxu0 %v62_v15 }
  0x1a   :  { %3257 = vmatpush3.msra.mxu0 %v62_v15 }
  0x1b   :  { %3258 = vmatprep.subr.mxu0 %v61_v16 }
  0x1c   :  { %3259 = vmatpush3.msra.mxu0 %v61_v16 }
  0x1d   :  { %3295 = vmatprep.subr.bf16.mxu0 %v3697_v6 }
  0x1e   :  { %16 = vsyncpa [#allocation3], 0  ;;  %v47_v17 = vlaneseq  ;;  %vm74_vm1 = vcmask 818176   ;;  %v160_v24 = vld [vmem:[%s4422_s4] sm:$0xff]  ;;  %vm163_vm4 = vcmask 261120   ;;  %v3570_v40 = vld [vmem:[%s4423_s5 + $0x8] sm:$0xff]  }
  0x1f   :  { %v3571_v41 = vld [vmem:[%s4423_s5 + $0x38] sm:$0xff]   ;;  %3264 = vmatpush3.bf16.msra.mxu1 %v3570_v40  ;;  %v3572_v42 = vld [vmem:[%s4423_s5] sm:$0xff]   ;;  %v3573_v43 = vld [vmem:[%s4423_s5 + $0x30] sm:$0xff]   ;;  %vm3698_vm5 = vmmov 0   ;;  %vm593_vm6 = vcmask 130048   ;;  %vm640_vm7 = vcmask 64512  }
  0x20   :  { %v48_v18 = vand.u32 127, %v47_v17  ;;  %3265 = vmatprep.subr.bf16.mxu1 %v3697_v6  ;;  %3267 = vmatprep.mubr.msk.bf16.mxu1 %vm3698_vm5, %v3697_v6  ;;  %v3838_v50 = vshrl.u32 %v47_v17, 7  ;;  %v3846_v52 = vld [vmem:[%s4420_s2] sm:$0xff]  ;;  %v3574_v0 = vld [vmem:[%s4423_s5 + $0x28] sm:$0xff]   ;;  %v3578_v5 = vld [vmem:[%s4423_s5 + $0x18] sm:$0xff]   ;;  %vm1386_vm8 = vcmask 523264  }
  0x21   :  { %v3575_v2 = vld [vmem:[%s4423_s5 + $0x20] sm:$0xff]   ;;  %v3576_v3 = vld [vmem:[%s4423_s5 + $0x48] sm:$0xff]   ;;  %v3579_v7 = vld [vmem:[%s4423_s5 + $0x10] sm:$0xff]   ;;  %vm2742_vm9 = vcmask 1041409   ;;  %vm2920_vm10 = vcmask 123904  }
  0x22   :  { %v3841_v51 = vsub.s32 0, %v3838_v50  ;;  %v3849_v54 = vsub.s32 1, %v3838_v50  ;;  %v3577_v4 = vld [vmem:[%s4423_s5 + $0x40] sm:$0xff]   ;;  %v3580_v8 = vld [vmem:[%s4423_s5 + $0x58] sm:$0xff]   ;;  %v3581_v9 = vld [vmem:[%s4423_s5 + $0x50] sm:$0xff]   ;;  %v3912_v16 = vsub.s32 4, %v3838_v50 }
  0x23   :  { %3266 = vmatpush3.bf16.msra.mxu1 %v3572_v42 }
  0x24   :  { %3271 = vmatprep.subr.bf16.mxu1 %v3697_v6  ;;  %v194_v56 = vrot.slane %v3846_v52, %v3841_v51  ;;  %v200_v60 = vrot.slane %v3846_v52, %v3849_v54 }
  0x7d   :  { %v51_v19 = vpop.permute.xlu0 %50 }
  0x7e   :  { %vm55_vm2 = vcmp.eq.s32.totalorder %v51_v19, %v48_v18 }
  0x7f   :  { %v2960_v20 = vsel %vm55_vm2, 1.0, %v3697_v6 }
  0x80   :  { %3260 = vmatprep.mubr.msk.f32.mxu0 %vm74_vm1, %v2960_v20  ;;  %v3915_v20 = vsub.s32 2, %v3838_v50 }
  0x81   :  { %v54_v21 = vpop.permute.xlu0 %53 }
  0x82   :  { %vm56_vm3 = vcmp.eq.s32.totalorder %v54_v21, %v48_v18  ;;  %v284_v21 = vrot.slane %v3846_v52, %v3912_v16 }
  0x83   :  { %v2961_v22 = vsel %vm56_vm3, 1.0, %v3697_v6 }
  0x84   :  { %3261 = vmatmul.mubr.msk.f32.vlgmr.msra.gmra.mxu0 %vm74_vm1, %v2961_v22 }
  0x85   :  { %3296 = vmatpush3.bf16.msra.mxu0 %v3571_v41  ;;  %3299 = vmatprep.mubr.msk.bf16.mxu0 %vm3698_vm5, %v3697_v6  ;;  %v3936_v41 = vsub.s32 3, %v3838_v50 }
  0x86   :  { %3297 = vmatprep.subr.bf16.mxu0 %v3697_v6 }
  0x89   :  { %3298 = vmatpush3.bf16.msra.mxu0 %v3573_v43 }
  0x8a   :  { %3311 = vmatprep.subr.bf16.mxu0 %v3697_v6 }
 0x144   :  { %v3262_v23 = vpop.f32.mrf.mxu0 }
 0x145   :  { %v162_v27 = vadd.f32 %v3262_v23, %v160_v24  ;;  %v3920_v23 = vsub.s32 5, %v3838_v50 }
 0x146   :  { %v151_v25 = vpop.f32.mrf.mxu0 }
 0x147   :  { %v161_v26 = vadd.f32 %v160_v24, %v151_v25  ;;  %v167_v29 = vsel %vm163_vm4, %v162_v27, 0.0  ;;  %v222_v25 = vrot.slane %v3846_v52, %v3915_v20 }
 0x149   :  { %v164_v28 = vsel %vm163_vm4, %v161_v26, 0.0 }
 0x14a   :  { %165 = vadd.xlane.f32.xlu1 %v164_v28  ;;  %v3925_v28 = vsub.s32 6, %v3838_v50 }
 0x14e   :  { %168 = vadd.xlane.f32.xlu1 %v167_v29 }
 0x1d3   :  { %v166_v30 = vpop.xlane.xlu1 %165 }
 0x1d4   :  { %v171_v31 = vmul.f32 0.03125, %v166_v30  ;;  %v475_v30 = vrot.slane %v3846_v52, %v3920_v23 }
 0x1d6   :  { %v173_v32 = vsub.f32 %v161_v26, %v171_v31 }
 0x1d7   :  { %v169_v33 = vpop.xlane.xlu1 %168 }
 0x1d8   :  { %v172_v34 = vmul.f32 0.03125, %v169_v33  ;;  %v175_v35 = vmul.f32 %v173_v32, %v173_v32 }
 0x1da   :  { %v174_v36 = vsub.f32 %v162_v27, %v172_v34  ;;  %v177_v37 = vsel %vm163_vm4, %v175_v35, 0.0 }
 0x1db   :  { %178 = vadd.xlane.f32.xlu0 %v177_v37 }
 0x1dc   :  { %v176_v38 = vmul.f32 %v174_v36, %v174_v36 }
 0x1de   :  { %v180_v39 = vsel %vm163_vm4, %v176_v38, 0.0 }
 0x1df   :  { %181 = vadd.xlane.f32.xlu1 %v180_v39 }
 0x264   :  { %v179_v44 = vpop.xlane.xlu0 %178 }
 0x265   :  { %v183_v45 = vmul.f32 0.03125, %v179_v44 }
 0x267   :  { %v185_v46 = vadd.f32 1e-12, %v183_v45 }
 0x268   :  { %v182_v47 = vpop.xlane.xlu1 %181 }
 0x269   :  { %3610 = vrsqrt.f32 %v185_v46  ;;  %v184_v48 = vmul.f32 0.03125, %v182_v47 }
 0x26b   :  { %v186_v49 = vadd.f32 1e-12, %v184_v48 }
 0x26d   :  { %3612 = vrsqrt.f32 %v186_v49 }
 0x276   :  { %v3611_v53 = vpop.eup %3610 }
 0x277   :  { %v189_v55 = vmul.f32 %v3611_v53, %v173_v32  ;;  %v416_v53 = vrot.slane %v3846_v52, %v3936_v41 }
 0x279   :  { %v195_v58 = vmul.f32 %v194_v56, %v189_v55 }
 0x27a   :  { %v3613_v57 = vpop.eup %3612 }
 0x27b   :  { %v190_v59 = vmul.f32 %v3613_v57, %v174_v36  ;;  %v3855_v62 = vadd.f32 %v200_v60, %v195_v58  ;;  %v341_v36 = vrot.slane %v3846_v52, %v3925_v28 }
 0x27d   :  { %v196_v61 = vmul.f32 %v194_v56, %v190_v59 }
 0x27f   :  { %v3857_v63 = vadd.f32 %v200_v60, %v196_v61 }
 0x281   :  { %v204_v1 = vpack.c.bf16 %v3857_v63, %v3855_v62 }
 0x283   :  { %3268 = vmatmul.mubr.msk.bf16.vlgmr.msra.gmra.mxu1 %vm163_vm4, %v204_v1  ;;  %3300 = vmatmul.mubr.msk.bf16.vlgmr.msra.gmra.mxu0 %vm163_vm4, %v204_v1 }
 0x284   :  { %3272 = vmatpush3.bf16.msra.mxu1 %v3574_v0  ;;  %3275 = vmatprep.mubr.msk.bf16.mxu1 %vm3698_vm5, %v3697_v6  ;;  %v3958_v0 = vsub.s32 7, %v3838_v50 }
 0x285   :  { %3273 = vmatprep.subr.bf16.mxu1 %v3697_v6  ;;  %3313 = vmatprep.mubr.msk.bf16.mxu0 %vm3698_vm5, %v3697_v6 }
 0x288   :  { %3274 = vmatpush3.bf16.msra.mxu1 %v3575_v2 }
 0x289   :  { %3279 = vmatprep.subr.bf16.mxu1 %v3697_v6 }
 0x28b   :  { %3276 = vmatmul.mubr.msk.bf16.vlgmr.msra.gmra.mxu1 %vm163_vm4, %v204_v1 }
 0x28c   :  { %3280 = vmatpush3.bf16.msra.mxu1 %v3576_v3  ;;  %3283 = vmatprep.mubr.msk.bf16.mxu1 %vm3698_vm5, %v3697_v6 }
 0x28d   :  { %3281 = vmatprep.subr.bf16.mxu1 %v3697_v6 }
 0x290   :  { %3282 = vmatpush3.bf16.msra.mxu1 %v3577_v4 }
 0x291   :  { %3287 = vmatprep.subr.bf16.mxu1 %v3697_v6 }
 0x293   :  { %3284 = vmatmul.mubr.msk.bf16.vlgmr.msra.gmra.mxu1 %vm163_vm4, %v204_v1 }
 0x294   :  { %3288 = vmatpush3.bf16.msra.mxu1 %v3578_v5  ;;  %3291 = vmatprep.mubr.msk.bf16.mxu1 %vm3698_vm5, %v3697_v6 }
 0x295   :  { %3289 = vmatprep.subr.bf16.mxu1 %v3697_v6 }
 0x298   :  { %3290 = vmatpush3.bf16.msra.mxu1 %v3579_v7  ;;  %v532_v7 = vrot.slane %v3846_v52, %v3958_v0 }
 0x299   :  { %3303 = vmatprep.subr.bf16.mxu1 %v3697_v6 }
 0x29b   :  { %3292 = vmatmul.mubr.msk.bf16.vlgmr.msra.gmra.mxu1 %vm163_vm4, %v204_v1 }
 0x29c   :  { %3304 = vmatpush3.bf16.msra.mxu1 %v3580_v8  ;;  %3307 = vmatprep.mubr.msk.bf16.mxu1 %vm3698_vm5, %v3697_v6 }
 0x29d   :  { %3305 = vmatprep.subr.bf16.mxu1 %v3697_v6 }
 0x2a0   :  { %3306 = vmatpush3.bf16.msra.mxu1 %v3581_v9 }
 0x2a1   :  { %3317 = vmatprep.subr.bf16.mxu1 %v3697_v6 }
 0x2a3   :  { %3308 = vmatmul.mubr.msk.bf16.vlgmr.msra.gmra.mxu1 %vm163_vm4, %v204_v1 }
 0x2a4   :  { %3319 = vmatprep.mubr.msk.bf16.mxu1 %vm3698_vm5, %v3697_v6 }
 0x343   :  { %v272_v10 = vpop.f32.mrf.mxu1  ;;  %v522_v11 = vpop.f32.mrf.mxu0 }
 0x344   :  { %v273_v34 = vadd.f32 %v272_v10, %v222_v25  ;;  %v523_v39 = vadd.f32 %v522_v11, %v475_v30 }
 0x345   :  { %v3269_v12 = vpop.f32.mrf.mxu1  ;;  %v3301_v13 = vpop.f32.mrf.mxu0 }
 0x346   :  { %v279_v43 = vmul.f32 0.25, %v273_v34  ;;  %v3973_v13 = vld [vmem:[%s4419_s1] sm:$0x3] }
 0x347   :  { %v275_v14 = vpop.f32.mrf.mxu1  ;;  %v525_v15 = vpop.f32.mrf.mxu0  ;;  %v3977_v52 = vrot.slane %v3973_v13, %v3841_v51 }
 0x348   :  { %v276_v31 = vadd.f32 %v275_v14, %v222_v25  ;;  %v526_v35 = vadd.f32 %v525_v15, %v475_v30 }
 0x349   :  { %v3270_v17 = vpop.f32.mrf.mxu1  ;;  %v3302_v18 = vpop.f32.mrf.mxu0 }
 0x34a   :  { %v280_v40 = vmul.f32 0.25, %v276_v31  ;;  %v3939_v44 = vpack.c.bf16 %v526_v35, %v523_v39 }
 0x34b   :  { %v331_v19 = vpop.f32.mrf.mxu1 }
 0x34c   :  { %v332_v26 = vadd.f32 %v331_v19, %v284_v21  ;;  %v3941_v48 = vpack.c.bf16 %v280_v40, %v279_v43  ;;  %v706_v57 = vsel %vm593_vm6, %v3939_v44, 0 }
 0x34d   :  { %v3277_v22 = vpop.f32.mrf.mxu1 }
 0x34f   :  { %v334_v24 = vpop.f32.mrf.mxu1 }
 0x350   :  { %v335_v27 = vadd.f32 %v334_v24, %v284_v21 }
 0x351   :  { %v3278_v29 = vpop.f32.mrf.mxu1 }
 0x352   :  { %v3929_v32 = vpack.c.bf16 %v335_v27, %v332_v26 }
 0x353   :  { %v388_v33 = vpop.f32.mrf.mxu1 }
 0x354   :  { %v598_v37 = vsel %vm593_vm6, %v3929_v32, 0  ;;  %v389_v45 = vadd.f32 %v388_v33, %v341_v36 }
 0x355   :  { %v3285_v38 = vpop.f32.mrf.mxu1  ;;  %3312 = vmatpush3.bf16.xpose.msra.mxu0 %v598_v37 }
 0x356   :  { %3323 = vmatprep.subr.bf16.mxu0 %v3697_v6 }
 0x357   :  { %v391_v42 = vpop.f32.mrf.mxu1 }
 0x358   :  { %v392_v46 = vadd.f32 %v391_v42, %v341_v36 }
 0x359   :  { %v3286_v47 = vpop.f32.mrf.mxu1 }
 0x35a   :  { %v3943_v49 = vpack.c.bf16 %v392_v46, %v389_v45  ;;  %v3997_v46 = vld [vmem:[%s4424_s6] sm:$0xff]   ;;  %v3583_v47 = vld [vmem:[%s4424_s6 + $0x8] sm:$0xff]  }
 0x35b   :  { %v463_v55 = vpop.f32.mrf.mxu1 }
 0x35c   :  { %3314 = vmatmul.mubr.msk.bf16.vlgmr.msra.gmra.mxu0 %vm593_vm6, %v3941_v48  ;;  %v655_v56 = vsel %vm81_vm0, %v3943_v49, 0  ;;  %v464_v59 = vadd.f32 %v463_v55, %v416_v53 }
 0x35d   :  { %v3293_v58 = vpop.f32.mrf.mxu1  ;;  %3318 = vmatpush3.bf16.msra.mxu1 %v655_v56  ;;  %3324 = vmatpush3.bf16.xpose.msra.mxu0 %v706_v57 }
 0x35e   :  { %3325 = vmatprep.mubr.msk.bf16.mxu0 %vm3698_vm5, %v3697_v6  ;;  %3329 = vmatprep.subr.bf16.mxu1 %v3697_v6  ;;  %v470_v2 = vmul.f32 0.25, %v464_v59  ;;  %v973_v58 = vrot.slane %v3943_v49, 4 }
 0x35f   :  { %v466_v60 = vpop.f32.mrf.mxu1  ;;  %3335 = vmatprep.subr.bf16.mxu0 %v3697_v6 }
 0x360   :  { %v467_v61 = vadd.f32 %v466_v60, %v416_v53 }
 0x361   :  { %v3294_v1 = vpop.f32.mrf.mxu1 }
 0x362   :  { %v471_v3 = vmul.f32 0.25, %v467_v61 }
 0x363   :  { %v579_v4 = vpop.f32.mrf.mxu1 }
 0x364   :  { %v3960_v5 = vpack.c.bf16 %v471_v3, %v470_v2  ;;  %v580_v10 = vadd.f32 %v579_v4, %v532_v7  ;;  %v978_v2 = vsel %vm81_vm0, %v973_v58, 0 }
 0x365   :  { %v3309_v8 = vpop.f32.mrf.mxu1 }
 0x366   :  { %3326 = vmatmul.mubr.msk.bf16.vlgmr.msra.gmra.mxu0 %vm593_vm6, %v3960_v5  ;;  %v915_v8 = vrot.slane %v3929_v32, 4 }
 0x367   :  { %v582_v9 = vpop.f32.mrf.mxu1  ;;  %3337 = vmatprep.mubr.msk.bf16.mxu0 %vm3698_vm5, %v3697_v6  ;;  %3336 = vmatpush3.bf16.msra.mxu0 %v3583_v47 }
 0x368   :  { %v583_v50 = vadd.f32 %v582_v9, %v532_v7  ;;  %3347 = vmatprep.subr.bf16.mxu0 %v3697_v6 }
 0x369   :  { %v3310_v11 = vpop.f32.mrf.mxu1 }
 0x36a   :  { %v3968_v12 = vpack.c.bf16 %v583_v50, %v580_v10  ;;  %v920_v11 = vsel %vm593_vm6, %v915_v8, 0 }
 0x36c   :  { %v762_v39 = vsel %vm81_vm0, %v3968_v12, 0 }
 0x41c   :  { %v634_v14 = vpop.f32.mrf.mxu0 }
 0x41d   :  { %v635_v15 = vadd.f32 %v634_v14, %v3977_v52 }
 0x41e   :  { %v3315_v17 = vpop.f32.mrf.mxu0 }
 0x41f   :  { %v641_v18 = vsel %vm640_vm7, %v635_v15, -inf  ;;  %v913_v17 = vrot.slane %v3941_v48, 4 }
 0x420   :  { %642 = vmax.xlane.f32.xlu1 %v641_v18  ;;  %v637_v19 = vpop.f32.mrf.mxu0  ;;  %v1024_v18 = vrot.slane %v3960_v5, 4 }
 0x422   :  { %v3316_v21 = vpop.f32.mrf.mxu0 }
 0x426   :  { %v742_v22 = vpop.f32.mrf.mxu0 }
 0x427   :  { %v743_v24 = vadd.f32 %v742_v22, %v3977_v52 }
 0x428   :  { %v3327_v25 = vpop.f32.mrf.mxu0 }
 0x429   :  { %v748_v26 = vsel %vm640_vm7, %v743_v24, -inf }
 0x42a   :  { %749 = vmax.xlane.f32.xlu1 %v748_v26  ;;  %v745_v27 = vpop.f32.mrf.mxu0 }
 0x42b   :  { %v4031_v27 = vrot.slane %v3973_v13, %v3849_v54 }
 0x42c   :  { %v3328_v29 = vpop.f32.mrf.mxu0 }
 0x4a9   :  { %v643_v30 = vpop.xlane.xlu1 %642 }
 0x4aa   :  { %v644_v31 = vsub.f32 %v635_v15, %v643_v30  ;;  %v1026_v15 = vrot.slane %v3939_v44, 4 }
 0x4ac   :  { %v645_v33 = vmul.f32 1.442695, %v644_v31  ;;  %v1031_v32 = vsel %vm593_vm6, %v1026_v15, 0 }
 0x4ae   :  { %3614 = vpow2.f32 %v645_v33 }
 0x4b3   :  { %v750_v34 = vpop.xlane.xlu1 %749 }
 0x4b4   :  { %v751_v35 = vsub.f32 %v743_v24, %v750_v34 }
 0x4b6   :  { %v752_v36 = vmul.f32 1.442695, %v751_v35 }
 0x4b8   :  { %3616 = vpow2.f32 %v752_v36 }
 0x4bb   :  { %v3615_v37 = vpop.eup %3614 }
 0x4bc   :  { %v650_v38 = vpack.c.bf16 %v3615_v37, %v3615_v37  ;;  %v647_v45 = vsel %vm640_vm7, %v3615_v37, 0.0 }
 0x4be   :  { %3320 = vmatmul.mubr.msk.bf16.vlgmr.msra.gmra.mxu1 %vm640_vm7, %v650_v38 }
 0x4bf   :  { %3330 = vmatpush3.bf16.msra.mxu1 %v762_v39  ;;  %3331 = vmatprep.mubr.msk.bf16.mxu1 %vm3698_vm5, %v3697_v6 }
 0x4c0   :  { %3341 = vmatprep.subr.bf16.mxu1 %v3697_v6 }
 0x4c5   :  { %v3617_v40 = vpop.eup %3616 }
 0x4c6   :  { %v754_v42 = vsel %vm640_vm7, %v3617_v40, 0.0  ;;  %v757_v43 = vpack.c.bf16 %v3617_v40, %v3617_v40 }
 0x4c7   :  { %755 = vadd.xlane.f32.xlu1 %v754_v42 }
 0x4c8   :  { %3332 = vmatmul.mubr.msk.bf16.vlgmr.msra.gmra.mxu1 %vm640_vm7, %v757_v43 }
 0x4c9   :  { %3343 = vmatprep.mubr.msk.bf16.mxu1 %vm3698_vm5, %v3697_v6  ;;  %3342 = vmatpush3.bf16.msra.mxu1 %v3997_v46 }
 0x4ca   :  { %3353 = vmatprep.subr.bf16.mxu1 %v3697_v6 }
 0x4cb   :  { %648 = vadd.xlane.f32.xlu1 %v647_v45 }
 0x550   :  { %v756_v53 = vpop.xlane.xlu1 %755 }
 0x554   :  { %v649_v55 = vpop.xlane.xlu1 %648 }
 0x555   :  { %3618 = vrcp.f32 %v649_v55 }
 0x556   :  { %3620 = vrcp.f32 %v756_v53 }
 0x562   :  { %v3619_v56 = vpop.eup %3618 }
 0x563   :  { %v3621_v4 = vpop.eup %3620 }
 0x57e   :  { %v691_v57 = vpop.f32.mrf.mxu1 }
 0x57f   :  { %v698_v59 = vmul.f32 %v3619_v56, %v691_v57 }
 0x580   :  { %v3321_v60 = vpop.f32.mrf.mxu1 }
 0x581   :  { %v699_v61 = vpack.c.bf16 %v698_v59, %v698_v59  ;;  %v1084_v59 = vrot.slane %v3968_v12, 4 }
 0x582   :  { %v694_v1 = vpop.f32.mrf.mxu1 }
 0x583   :  { %3344 = vmatmul.mubr.msk.bf16.vlgmr.msra.gmra.mxu1 %vm593_vm6, %v699_v61 }
 0x584   :  { %3354 = vmatpush3.bf16.msra.mxu1 %v978_v2  ;;  %v3322_v3 = vpop.f32.mrf.mxu1  ;;  %3355 = vmatprep.mubr.msk.bf16.mxu1 %vm3698_vm5, %v3697_v6 }
 0x585   :  { %3365 = vmatprep.subr.bf16.mxu1 %v3697_v6  ;;  %v1089_v3 = vsel %vm81_vm0, %v1084_v59, 0 }
 0x588   :  { %v798_v7 = vpop.f32.mrf.mxu1 }
 0x589   :  { %v805_v49 = vmul.f32 %v3621_v4, %v798_v7 }
 0x58a   :  { %v3333_v9 = vpop.f32.mrf.mxu1 }
 0x58b   :  { %v806_v10 = vpack.c.bf16 %v805_v49, %v805_v49 }
 0x58c   :  { %v801_v50 = vpop.f32.mrf.mxu1 }
 0x58d   :  { %3338 = vmatmul.mubr.msk.bf16.vlgmr.msra.gmra.mxu0 %vm593_vm6, %v806_v10 }
 0x58e   :  { %3348 = vmatpush3.bf16.xpose.msra.mxu0 %v920_v11  ;;  %v3334_v14 = vpop.f32.mrf.mxu1  ;;  %3349 = vmatprep.mubr.msk.bf16.mxu0 %vm3698_vm5, %v3697_v6 }
 0x58f   :  { %3359 = vmatprep.subr.bf16.mxu0 %v3697_v6 }
 0x595   :  { %3350 = vmatmul.mubr.msk.bf16.vlgmr.msra.gmra.mxu0 %vm593_vm6, %v913_v17 }
 0x596   :  { %3360 = vmatpush3.bf16.xpose.msra.mxu0 %v1031_v32  ;;  %3361 = vmatprep.mubr.msk.bf16.mxu0 %vm3698_vm5, %v3697_v6 }
 0x597   :  { %3371 = vmatprep.subr.bf16.mxu0 %v3697_v6 }
 0x59d   :  { %3362 = vmatmul.mubr.msk.bf16.vlgmr.msra.gmra.mxu0 %vm593_vm6, %v1024_v18 }
 0x59e   :  { %3372 = vmatpush3.bf16.msra.mxu0 %v3583_v47  ;;  %3373 = vmatprep.mubr.msk.bf16.mxu0 %vm3698_vm5, %v3697_v6  ;;  %v4040_v47 = vld [vmem:[%s4420_s2 + $0x8] sm:$0xff] }
 0x59f   :  { %3383 = vmatprep.subr.bf16.mxu0 %v3697_v6  ;;  %v1223_v56 = vrot.slane %v4040_v47, %v3841_v51 }
 0x643   :  { %v902_v44 = vpop.f32.mrf.mxu1 }
 0x645   :  { %v3345_v48 = vpop.f32.mrf.mxu1 }
 0x647   :  { %v905_v19 = vpop.f32.mrf.mxu1 }
 0x649   :  { %v3346_v21 = vpop.f32.mrf.mxu1 }
 0x64d   :  { %v853_v22 = vpop.f32.mrf.mxu0 }
 0x64e   :  { %v903_v24 = vadd.f32 %v902_v44, %v853_v22 }
 0x64f   :  { %v3339_v25 = vpop.f32.mrf.mxu0 }
 0x650   :  { %v1224_v58 = vadd.f32 %v1223_v56, %v903_v24 }
 0x651   :  { %v856_v26 = vpop.f32.mrf.mxu0 }
 0x652   :  { %v1226_v2 = vadd.f32 %v1224_v58, %v3855_v62 }
 0x653   :  { %v3340_v5 = vpop.f32.mrf.mxu0 }
 0x654   :  { %v1228_v4 = vsel %vm163_vm4, %v1226_v2, 0.0 }
 0x655   :  { %v956_v29 = vpop.f32.mrf.mxu0 }
 0x656   :  { %v957_v30 = vadd.f32 %v956_v29, %v4031_v27 }
 0x657   :  { %v3351_v31 = vpop.f32.mrf.mxu0 }
 0x658   :  { %v962_v33 = vsel %vm640_vm7, %v957_v30, -inf }
 0x659   :  { %963 = vmax.xlane.f32.xlu1 %v962_v33  ;;  %v959_v34 = vpop.f32.mrf.mxu0 }
 0x65b   :  { %v3352_v35 = vpop.f32.mrf.mxu0 }
 0x65d   :  { %v1067_v36 = vpop.f32.mrf.mxu0 }
 0x65e   :  { %v1068_v37 = vadd.f32 %v1067_v36, %v4031_v27 }
 0x65f   :  { %v3363_v38 = vpop.f32.mrf.mxu0 }
 0x660   :  { %v1073_v39 = vsel %vm640_vm7, %v1068_v37, -inf }
 0x661   :  { %1074 = vmax.xlane.f32.xlu1 %v1073_v39  ;;  %v1070_v40 = vpop.f32.mrf.mxu0 }
 0x663   :  { %v3364_v13 = vpop.f32.mrf.mxu0 }
 0x6e2   :  { %v964_v42 = vpop.xlane.xlu1 %963 }
 0x6e3   :  { %v965_v43 = vsub.f32 %v957_v30, %v964_v42 }
 0x6e5   :  { %v966_v45 = vmul.f32 1.442695, %v965_v43 }
 0x6e7   :  { %3622 = vpow2.f32 %v966_v45 }
 0x6ea   :  { %v1075_v53 = vpop.xlane.xlu1 %1074 }
 0x6eb   :  { %v1076_v55 = vsub.f32 %v1068_v37, %v1075_v53 }
 0x6ed   :  { %v1077_v57 = vmul.f32 1.442695, %v1076_v55 }
 0x6ef   :  { %3624 = vpow2.f32 %v1077_v57  ;;  %v3584_v57 = vld [vmem:[%s4425_s7 + $0x8] sm:$0xff]  }
 0x6f4   :  { %v3623_v60 = vpop.eup %3622 }
 0x6f5   :  { %v968_v61 = vsel %vm640_vm7, %v3623_v60, 0.0  ;;  %v971_v1 = vpack.c.bf16 %v3623_v60, %v3623_v60 }
 0x6f6   :  { %969 = vadd.xlane.f32.xlu1 %v968_v61 }
 0x6f7   :  { %3356 = vmatmul.mubr.msk.bf16.vlgmr.msra.gmra.mxu1 %vm640_vm7, %v971_v1 }
 0x6f8   :  { %3366 = vmatpush3.bf16.msra.mxu1 %v1089_v3  ;;  %3367 = vmatprep.mubr.msk.bf16.mxu1 %vm3698_vm5, %v3697_v6 }
 0x6f9   :  { %3377 = vmatprep.subr.bf16.mxu1 %v3697_v6 }
 0x6fa   :  { %1229 = vadd.xlane.f32.xlu1 %v1228_v4  ;;  %v1257_v4 = vrot.slane %v4040_v47, %v3849_v54 }
 0x6fc   :  { %v3625_v12 = vpop.eup %3624 }
 0x6fd   :  { %v1079_v7 = vsel %vm640_vm7, %v3625_v12, 0.0  ;;  %v1082_v8 = vpack.c.bf16 %v3625_v12, %v3625_v12 }
 0x6fe   :  { %1080 = vadd.xlane.f32.xlu0 %v1079_v7 }
 0x6ff   :  { %3368 = vmatmul.mubr.msk.bf16.vlgmr.msra.gmra.mxu1 %vm640_vm7, %v1082_v8 }
 0x700   :  { %3378 = vmatpush3.bf16.msra.mxu1 %v3997_v46  ;;  %3379 = vmatprep.mubr.msk.bf16.mxu1 %vm3698_vm5, %v3697_v6 }
 0x701   :  { %3391 = vmatprep.subr.bf16.mxu1 %v3697_v6 }
 0x77f   :  { %v970_v62 = vpop.xlane.xlu1 %969 }
 0x780   :  { %3626 = vrcp.f32 %v970_v62  ;;  %v1263_v62 = vrot.slane %v4040_v47, %v3915_v20 }
 0x783   :  { %v1230_v49 = vpop.xlane.xlu1 %1229 }
 0x784   :  { %v1234_v9 = vmul.f32 0.03125, %v1230_v49 }
 0x786   :  { %v1236_v10 = vsub.f32 %v1226_v2, %v1234_v9 }
 0x787   :  { %v1081_v14 = vpop.xlane.xlu0 %1080 }
 0x788   :  { %v1238_v50 = vmul.f32 %v1236_v10, %v1236_v10  ;;  %3628 = vrcp.f32 %v1081_v14  ;;  %v3587_v14 = vld [vmem:[%s4426_s8 + $0x10] sm:$0xff]  }
 0x78a   :  { %v1240_v11 = vsel %vm163_vm4, %v1238_v50, 0.0 }
 0x78b   :  { %1241 = vadd.xlane.f32.xlu1 %v1240_v11 }
 0x78d   :  { %v3627_v15 = vpop.eup %3626 }
 0x795   :  { %v3629_v19 = vpop.eup %3628 }
 0x7b7   :  { %v1014_v17 = vpop.f32.mrf.mxu1 }
 0x7b8   :  { %v1021_v32 = vmul.f32 %v3627_v15, %v1014_v17  ;;  %v3588_v15 = vld [vmem:[%s4426_s8 + $0x8] sm:$0xff]   ;;  %v3589_v17 = vld [vmem:[%s4426_s8] sm:$0xff]  }
 0x7b9   :  { %v3357_v46 = vpop.f32.mrf.mxu1 }
 0x7ba   :  { %v1022_v18 = vpack.c.bf16 %v1021_v32, %v1021_v32  ;;  %v1274_v32 = vrot.slane %v4040_v47, %v3936_v41 }
 0x7bb   :  { %v1017_v44 = vpop.f32.mrf.mxu1 }
 0x7bc   :  { %3380 = vmatmul.mubr.msk.bf16.vlgmr.msra.gmra.mxu1 %vm593_vm6, %v1022_v18 }
 0x7bd   :  { %v3358_v48 = vpop.f32.mrf.mxu1  ;;  %3399 = vmatprep.mubr.msk.bf16.mxu1 %vm3698_vm5, %v3697_v6 }
 0x7bf   :  { %v1125_v21 = vpop.f32.mrf.mxu1 }
 0x7c0   :  { %v1132_v22 = vmul.f32 %v3629_v19, %v1125_v21 }
 0x7c1   :  { %v3369_v24 = vpop.f32.mrf.mxu1 }
 0x7c2   :  { %v1133_v25 = vpack.c.bf16 %v1132_v22, %v1132_v22 }
 0x7c3   :  { %v1128_v26 = vpop.f32.mrf.mxu1 }
 0x7c4   :  { %3374 = vmatmul.mubr.msk.bf16.vlgmr.msra.gmra.mxu0 %vm593_vm6, %v1133_v25 }
 0x7c5   :  { %v3370_v5 = vpop.f32.mrf.mxu1  ;;  %3387 = vmatprep.mubr.msk.bf16.mxu0 %vm3698_vm5, %v3697_v6  ;;  %3384 = vmatpush3.bf16.msra.mxu0 %v3584_v57 }
 0x7c6   :  { %3385 = vmatprep.subr.bf16.mxu0 %v3697_v6 }
 0x87c   :  { %v1214_v29 = vpop.f32.mrf.mxu1 }
 0x87e   :  { %v3381_v30 = vpop.f32.mrf.mxu1 }
 0x880   :  { %v1217_v31 = vpop.f32.mrf.mxu1 }
 0x882   :  { %v3382_v33 = vpop.f32.mrf.mxu1 }
 0x884   :  { %v1171_v34 = vpop.f32.mrf.mxu0 }
 0x885   :  { %v1215_v35 = vadd.f32 %v1214_v29, %v1171_v34 }
 0x886   :  { %v3375_v36 = vpop.f32.mrf.mxu0 }
 0x887   :  { %v1225_v37 = vadd.f32 %v1223_v56, %v1215_v35  ;;  %v1242_v56 = vpop.xlane.xlu1 %1241 }
 0x888   :  { %v1174_v38 = vpop.f32.mrf.mxu0  ;;  %v1246_v58 = vmul.f32 0.03125, %v1242_v56 }
 0x889   :  { %v1227_v39 = vadd.f32 %v1225_v37, %v3857_v63  ;;  %v3585_v63 = vld [vmem:[%s4425_s7] sm:$0xff]  }
 0x88a   :  { %v3376_v40 = vpop.f32.mrf.mxu0  ;;  %3386 = vmatpush3.bf16.msra.mxu0 %v3585_v63  ;;  %v1248_v59 = vadd.f32 1e-12, %v1246_v58 }
 0x88b   :  { %v1231_v13 = vsel %vm163_vm4, %v1227_v39, 0.0  ;;  %3403 = vmatprep.subr.bf16.mxu0 %v3697_v6 }
 0x88c   :  { %1232 = vadd.xlane.f32.xlu0 %v1231_v13  ;;  %3630 = vrsqrt.f32 %v1248_v59 }
 0x899   :  { %v3631_v2 = vpop.eup %3630 }
 0x89a   :  { %v1252_v3 = vmul.f32 %v3631_v2, %v1236_v10  ;;  %v3586_v10 = vld [vmem:[%s4426_s8 + $0x18] sm:$0xff]  }
 0x89b   :  { %3392 = vmatpush3.bf16.msra.mxu1 %v3586_v10  ;;  %v3591_v10 = vld [vmem:[%s4423_s5 + $0xa8] sm:$0xff]  }
 0x89c   :  { %v1258_v8 = vmul.f32 %v1257_v4, %v1252_v3  ;;  %3393 = vmatprep.subr.bf16.mxu1 %v3697_v6 }
 0x89e   :  { %v1264_v9 = vadd.f32 %v1263_v62, %v1258_v8 }
 0x89f   :  { %3394 = vmatpush3.bf16.msra.mxu1 %v3587_v14  ;;  %v3592_v14 = vld [vmem:[%s4423_s5 + $0x60] sm:$0xff]  }
 0x8a0   :  { %3395 = vmatprep.subr.bf16.mxu1 %v3697_v6 }
 0x8a3   :  { %3396 = vmatpush3.bf16.msra.mxu1 %v3588_v15  ;;  %v3593_v15 = vld [vmem:[%s4423_s5 + $0xa0] sm:$0xff]  }
 0x8a4   :  { %3397 = vmatprep.subr.bf16.mxu1 %v3697_v6 }
 0x8a7   :  { %3398 = vmatpush3.bf16.msra.mxu1 %v3589_v17 }
 0x8a8   :  { %3419 = vmatprep.subr.bf16.mxu1 %v3697_v6 }
 0x915   :  { %v1233_v42 = vpop.xlane.xlu0 %1232 }
 0x916   :  { %v1235_v43 = vmul.f32 0.03125, %v1233_v42 }
 0x918   :  { %v1237_v45 = vsub.f32 %v1227_v39, %v1235_v43 }
 0x91a   :  { %v1239_v53 = vmul.f32 %v1237_v45, %v1237_v45 }
 0x91c   :  { %v1243_v55 = vsel %vm163_vm4, %v1239_v53, 0.0 }
 0x91d   :  { %1244 = vadd.xlane.f32.xlu0 %v1243_v55 }
 0x9a6   :  { %v1245_v60 = vpop.xlane.xlu0 %1244 }
 0x9a7   :  { %v1247_v61 = vmul.f32 0.03125, %v1245_v60 }
 0x9a9   :  { %v1249_v1 = vadd.f32 1e-12, %v1247_v61 }
 0x9ab   :  { %3632 = vrsqrt.f32 %v1249_v1 }
 0x9b8   :  { %v3633_v12 = vpop.eup %3632 }
 0x9b9   :  { %v1253_v7 = vmul.f32 %v3633_v12, %v1237_v45  ;;  %v1361_v45 = vrot.slane %v4040_v47, %v3912_v16 }
 0x9bb   :  { %v1259_v49 = vmul.f32 %v1257_v4, %v1253_v7 }
 0x9bd   :  { %v1265_v50 = vadd.f32 %v1263_v62, %v1259_v49 }
 0x9bf   :  { %v1266_v11 = vpack.c.bf16 %v1265_v50, %v1264_v9 }
 0x9c1   :  { %3388 = vmatmul.mubr.msk.bf16.vlgmr.msra.gmra.mxu0 %vm163_vm4, %v1266_v11 }
 0x9c2   :  { %3407 = vmatprep.mubr.msk.bf16.mxu0 %vm3698_vm5, %v3697_v6 }
 0xa81   :  { %v1324_v46 = vpop.f32.mrf.mxu0 }
 0xa82   :  { %v1325_v18 = vadd.f32 %v1324_v46, %v1274_v32 }
 0xa83   :  { %v3389_v44 = vpop.f32.mrf.mxu0 }
 0xa84   :  { %v1331_v48 = vmul.f32 %v1325_v18, %v1325_v18 }
 0xa85   :  { %v1327_v19 = vpop.f32.mrf.mxu0 }
 0xa86   :  { %v1333_v21 = vmul.f32 %v1331_v48, %v1325_v18  ;;  %v1328_v22 = vadd.f32 %v1327_v19, %v1274_v32 }
 0xa87   :  { %v3390_v24 = vpop.f32.mrf.mxu0 }
 0xa88   :  { %v1335_v25 = vmul.f32 0.044715, %v1333_v21  ;;  %v1332_v26 = vmul.f32 %v1328_v22, %v1328_v22  ;;  %v1462_v21 = vrot.slane %v4040_v47, %v3920_v23 }
 0xa8a   :  { %v1337_v5 = vadd.f32 %v1335_v25, %v1325_v18  ;;  %v1334_v29 = vmul.f32 %v1332_v26, %v1328_v22  ;;  %v1468_v25 = vrot.slane %v4040_v47, %v3925_v28 }
 0xa8c   :  { %v1339_v30 = vmul.f32 0.7978846, %v1337_v5  ;;  %v1336_v31 = vmul.f32 0.044715, %v1334_v29 }
 0xa8e   :  { %3634 = vtanh.f32 %v1339_v30  ;;  %v1338_v33 = vadd.f32 %v1336_v31, %v1328_v22 }
 0xa90   :  { %v1340_v34 = vmul.f32 0.7978846, %v1338_v33  ;;  %v3594_v33 = vld [vmem:[%s4423_s5 + $0x88] sm:$0xff]  }
 0xa92   :  { %3636 = vtanh.f32 %v1340_v34  ;;  %v3595_v34 = vld [vmem:[%s4423_s5 + $0x98] sm:$0xff]  }
 0xa9b   :  { %v3635_v35 = vpop.eup %3634 }
 0xa9c   :  { %v1343_v36 = vadd.f32 1.0, %v3635_v35 }
 0xa9e   :  { %v1345_v38 = vmul.f32 0.5, %v1343_v36  ;;  %v3596_v36 = vld [vmem:[%s4423_s5 + $0x80] sm:$0xff]  }
 0xa9f   :  { %v3637_v37 = vpop.eup %3636 }
 0xaa0   :  { %v1344_v39 = vadd.f32 1.0, %v3637_v37  ;;  %v1347_v13 = vmul.f32 %v1345_v38, %v1325_v18  ;;  %v3597_v37 = vld [vmem:[%s4423_s5 + $0x90] sm:$0xff]   ;;  %v3598_v38 = vld [vmem:[%s4423_s5 + $0x78] sm:$0xff]  }
 0xaa2   :  { %v1346_v40 = vmul.f32 0.5, %v1344_v39  ;;  %v3599_v39 = vld [vmem:[%s4423_s5 + $0x70] sm:$0xff]  }
 0xaa4   :  { %v1348_v42 = vmul.f32 %v1346_v40, %v1328_v22  ;;  %v3600_v40 = vld [vmem:[%s4423_s5 + $0xb8] sm:$0xff]  }
 0xaa6   :  { %v1349_v43 = vpack.c.bf16 %v1348_v42, %v1347_v13  ;;  %v3601_v13 = vld [vmem:[%s4423_s5 + $0xb0] sm:$0xff]  }
 0xaa7   :  { %v4190_v42 = vld [vmem:[%s4420_s2 + $0x10] sm:$0xff] }
 0xaa8   :  { %3400 = vmatmul.mubr.msk.bf16.vlgmr.msra.gmra.mxu1 %vm1386_vm8, %v1349_v43 }
 0xaa9   :  { %3423 = vmatprep.mubr.msk.bf16.mxu1 %vm3698_vm5, %v3697_v6  ;;  %3420 = vmatpush3.bf16.msra.mxu1 %v3591_v10 }
 0xaaa   :  { %3421 = vmatprep.subr.bf16.mxu1 %v3697_v6 }
 0xaad   :  { %3422 = vmatpush3.bf16.msra.mxu1 %v3593_v15 }
 0xaae   :  { %3435 = vmatprep.subr.bf16.mxu1 %v3697_v6 }
 0xb68   :  { %v1424_v53 = vpop.f32.mrf.mxu1 }
 0xb69   :  { %v1425_v55 = vadd.f32 %v1424_v53, %v1361_v45  ;;  %v1609_v53 = vrot.slane %v4190_v42, %v3936_v41 }
 0xb6a   :  { %v3401_v57 = vpop.f32.mrf.mxu1 }
 0xb6b   :  { %v1431_v63 = vadd.f32 %v1425_v55, %v1264_v9 }
 0xb6c   :  { %v1427_v56 = vpop.f32.mrf.mxu1 }
 0xb6d   :  { %v1428_v58 = vadd.f32 %v1427_v56, %v1361_v45  ;;  %v1433_v59 = vsel %vm163_vm4, %v1431_v63, 0.0 }
 0xb6e   :  { %1434 = vadd.xlane.f32.xlu1 %v1433_v59  ;;  %v3402_v60 = vpop.f32.mrf.mxu1 }
 0xb6f   :  { %v1432_v61 = vadd.f32 %v1428_v58, %v1265_v50  ;;  %v3590_v50 = vld [vmem:[%s4423_s5 + $0x68] sm:$0xff]  }
 0xb70   :  { %3404 = vmatpush3.bf16.msra.mxu0 %v3590_v50 }
 0xb71   :  { %v1436_v1 = vsel %vm163_vm4, %v1432_v61, 0.0  ;;  %3405 = vmatprep.subr.bf16.mxu0 %v3697_v6 }
 0xb72   :  { %1437 = vadd.xlane.f32.xlu0 %v1436_v1 }
 0xb74   :  { %3406 = vmatpush3.bf16.msra.mxu0 %v3592_v14 }
 0xb75   :  { %3411 = vmatprep.subr.bf16.mxu0 %v3697_v6 }
 0xbf7   :  { %v1435_v2 = vpop.xlane.xlu1 %1434 }
 0xbf8   :  { %v1439_v3 = vmul.f32 0.03125, %v1435_v2 }
 0xbfa   :  { %v1441_v4 = vsub.f32 %v1431_v63, %v1439_v3 }
 0xbfb   :  { %v1438_v12 = vpop.xlane.xlu0 %1437 }
 0xbfc   :  { %v1440_v7 = vmul.f32 0.03125, %v1438_v12  ;;  %v1443_v8 = vmul.f32 %v1441_v4, %v1441_v4 }
 0xbfe   :  { %v1442_v62 = vsub.f32 %v1432_v61, %v1440_v7  ;;  %v1445_v49 = vsel %vm163_vm4, %v1443_v8, 0.0 }
 0xbff   :  { %1446 = vadd.xlane.f32.xlu1 %v1445_v49 }
 0xc00   :  { %v1444_v9 = vmul.f32 %v1442_v62, %v1442_v62 }
 0xc02   :  { %v1448_v11 = vsel %vm163_vm4, %v1444_v9, 0.0  ;;  %v1490_v9 = vrot.slane %v4040_v47, %v3958_v0 }
 0xc03   :  { %1449 = vadd.xlane.f32.xlu0 %v1448_v11 }
 0xc88   :  { %v1447_v17 = vpop.xlane.xlu1 %1446 }
 0xc89   :  { %v1451_v32 = vmul.f32 0.03125, %v1447_v17  ;;  %v1743_v17 = vrot.slane %v4190_v42, %v3915_v20 }
 0xc8b   :  { %v1453_v46 = vadd.f32 1e-12, %v1451_v32 }
 0xc8c   :  { %v1450_v18 = vpop.xlane.xlu0 %1449 }
 0xc8d   :  { %3638 = vrsqrt.f32 %v1453_v46  ;;  %v1452_v44 = vmul.f32 0.03125, %v1450_v18 }
 0xc8f   :  { %v1454_v48 = vadd.f32 1e-12, %v1452_v44 }
 0xc91   :  { %3640 = vrsqrt.f32 %v1454_v48 }
 0xc9a   :  { %v3639_v19 = vpop.eup %3638 }
 0xc9b   :  { %v1457_v22 = vmul.f32 %v3639_v19, %v1441_v4  ;;  %v1552_v4 = vrot.slane %v4190_v42, %v3849_v54 }
 0xc9d   :  { %v1463_v26 = vmul.f32 %v1462_v21, %v1457_v22 }
 0xc9e   :  { %v3641_v24 = vpop.eup %3640 }
 0xc9f   :  { %v1458_v5 = vmul.f32 %v3641_v24, %v1442_v62  ;;  %v4131_v30 = vadd.f32 %v1468_v25, %v1463_v26  ;;  %v1684_v26 = vrot.slane %v4190_v42, %v3841_v51 }
 0xca1   :  { %v1464_v29 = vmul.f32 %v1462_v21, %v1458_v5 }
 0xca3   :  { %v4133_v31 = vadd.f32 %v1468_v25, %v1464_v29 }
 0xca5   :  { %v1471_v35 = vpack.c.bf16 %v4133_v31, %v4131_v30 }
 0xca7   :  { %3408 = vmatmul.mubr.msk.bf16.vlgmr.msra.gmra.mxu0 %vm163_vm4, %v1471_v35  ;;  %3424 = vmatmul.mubr.msk.bf16.vlgmr.msra.gmra.mxu1 %vm163_vm4, %v1471_v35 }
 0xca8   :  { %3412 = vmatpush3.bf16.msra.mxu0 %v3594_v33  ;;  %3436 = vmatpush3.bf16.msra.mxu1 %v3595_v34 }
 0xca9   :  { %3413 = vmatprep.subr.bf16.mxu0 %v3697_v6  ;;  %3437 = vmatprep.subr.bf16.mxu1 %v3697_v6 }
 0xcaa   :  { %3415 = vmatprep.mubr.msk.bf16.mxu0 %vm3698_vm5, %v3697_v6  ;;  %3439 = vmatprep.mubr.msk.bf16.mxu1 %vm3698_vm5, %v3697_v6 }
 0xcac   :  { %3414 = vmatpush3.bf16.msra.mxu0 %v3596_v36  ;;  %3438 = vmatpush3.bf16.msra.mxu1 %v3597_v37  ;;  %v1800_v36 = vrot.slane %v4190_v42, %v3912_v16 }
 0xcad   :  { %3427 = vmatprep.subr.bf16.mxu0 %v3697_v6  ;;  %3451 = vmatprep.subr.bf16.mxu1 %v3697_v6 }
 0xcaf   :  { %3416 = vmatmul.mubr.msk.bf16.vlgmr.msra.gmra.mxu0 %vm163_vm4, %v1471_v35  ;;  %3440 = vmatmul.mubr.msk.bf16.vlgmr.msra.gmra.mxu1 %vm163_vm4, %v1471_v35 }
 0xcb0   :  { %3428 = vmatpush3.bf16.msra.mxu0 %v3598_v38  ;;  %3431 = vmatprep.mubr.msk.bf16.mxu0 %vm3698_vm5, %v3697_v6 }
 0xcb1   :  { %3429 = vmatprep.subr.bf16.mxu0 %v3697_v6  ;;  %3453 = vmatprep.mubr.msk.bf16.mxu1 %vm3698_vm5, %v3697_v6 }
 0xcb4   :  { %3430 = vmatpush3.bf16.msra.mxu0 %v3599_v39 }
 0xcb5   :  { %3443 = vmatprep.subr.bf16.mxu0 %v3697_v6 }
 0xcb7   :  { %3432 = vmatmul.mubr.msk.bf16.vlgmr.msra.gmra.mxu0 %vm163_vm4, %v1471_v35 }
 0xcb8   :  { %3444 = vmatpush3.bf16.msra.mxu0 %v3600_v40  ;;  %3447 = vmatprep.mubr.msk.bf16.mxu0 %vm3698_vm5, %v3697_v6 }
 0xcb9   :  { %3445 = vmatprep.subr.bf16.mxu0 %v3697_v6 }
 0xcbc   :  { %3446 = vmatpush3.bf16.msra.mxu0 %v3601_v13 }
 0xcbd   :  { %3457 = vmatprep.subr.bf16.mxu0 %v3697_v6 }
 0xcbf   :  { %3448 = vmatmul.mubr.msk.bf16.vlgmr.msra.gmra.mxu0 %vm163_vm4, %v1471_v35 }
 0xcc0   :  { %3459 = vmatprep.mubr.msk.bf16.mxu0 %vm3698_vm5, %v3697_v6 }
 0xd67   :  { %v1540_v43 = vpop.f32.mrf.mxu0  ;;  %v1656_v45 = vpop.f32.mrf.mxu1 }
 0xd68   :  { %v1657_v58 = vadd.f32 %v1656_v45, %v1609_v53  ;;  %v1541_v18 = vadd.f32 %v1540_v43, %v1490_v9 }
 0xd69   :  { %v3409_v55 = vpop.f32.mrf.mxu0  ;;  %v3425_v57 = vpop.f32.mrf.mxu1 }
 0xd6a   :  { %v1547_v24 = vmul.f32 0.25, %v1541_v18 }
 0xd6b   :  { %v1543_v63 = vpop.f32.mrf.mxu0  ;;  %v1659_v56 = vpop.f32.mrf.mxu1 }
 0xd6c   :  { %v1660_v59 = vadd.f32 %v1659_v56, %v1609_v53  ;;  %v1544_v15 = vadd.f32 %v1543_v63, %v1490_v9 }
 0xd6d   :  { %v3410_v60 = vpop.f32.mrf.mxu0  ;;  %v3426_v61 = vpop.f32.mrf.mxu1 }
 0xd6e   :  { %v4194_v1 = vpack.c.bf16 %v1660_v59, %v1657_v58  ;;  %v1548_v21 = vmul.f32 0.25, %v1544_v15 }
 0xd6f   :  { %v1599_v2 = vpop.f32.mrf.mxu0  ;;  %v1790_v3 = vpop.f32.mrf.mxu1 }
 0xd70   :  { %v1917_v8 = vsel %vm81_vm0, %v4194_v1, 0  ;;  %v1600_v11 = vadd.f32 %v1599_v2, %v1552_v4  ;;  %v1791_v47 = vadd.f32 %v1790_v3, %v1743_v17  ;;  %v4214_v29 = vpack.c.bf16 %v1548_v21, %v1547_v24 }
 0xd71   :  { %v3417_v12 = vpop.f32.mrf.mxu0  ;;  %v3441_v7 = vpop.f32.mrf.mxu1  ;;  %3458 = vmatpush3.bf16.msra.mxu0 %v1917_v8 }
 0xd72   :  { %3469 = vmatprep.subr.bf16.mxu0 %v3697_v6 }
 0xd73   :  { %v1602_v62 = vpop.f32.mrf.mxu0  ;;  %v1793_v49 = vpop.f32.mrf.mxu1 }
 0xd74   :  { %v1603_v50 = vadd.f32 %v1602_v62, %v1552_v4  ;;  %v1794_v44 = vadd.f32 %v1793_v49, %v1743_v17 }
 0xd75   :  { %v3418_v10 = vpop.f32.mrf.mxu0  ;;  %v3442_v14 = vpop.f32.mrf.mxu1 }
 0xd76   :  { %v4205_v32 = vpack.c.bf16 %v1603_v50, %v1600_v11  ;;  %v4210_v25 = vpack.c.bf16 %v1794_v44, %v1791_v47 }
 0xd77   :  { %v1731_v46 = vpop.f32.mrf.mxu0 }
 0xd78   :  { %v1861_v48 = vsel %vm593_vm6, %v4205_v32, 0  ;;  %v1732_v35 = vadd.f32 %v1731_v46, %v1684_v26  ;;  %v1969_v37 = vsel %vm593_vm6, %v4210_v25, 0 }
 0xd79   :  { %v3433_v19 = vpop.f32.mrf.mxu0  ;;  %3452 = vmatpush3.bf16.xpose.msra.mxu1 %v1861_v48  ;;  %v4251_v48 = vld [vmem:[%s4424_s6 + $0x10] sm:$0xff]  }
 0xd7a   :  { %3463 = vmatprep.subr.bf16.mxu1 %v3697_v6  ;;  %v1738_v13 = vmul.f32 0.25, %v1732_v35  ;;  %v3603_v19 = vld [vmem:[%s4424_s6 + $0x18] sm:$0xff]  }
 0xd7b   :  { %v1734_v22 = vpop.f32.mrf.mxu0 }
 0xd7c   :  { %v1735_v33 = vadd.f32 %v1734_v22, %v1684_v26  ;;  %v2232_v26 = vrot.slane %v4194_v1, 4 }
 0xd7d   :  { %v3434_v5 = vpop.f32.mrf.mxu0 }
 0xd7e   :  { %v1739_v39 = vmul.f32 0.25, %v1735_v33 }
 0xd7f   :  { %v1847_v34 = vpop.f32.mrf.mxu0 }
 0xd80   :  { %3454 = vmatmul.mubr.msk.bf16.vlgmr.msra.gmra.mxu1 %vm593_vm6, %v4214_v29  ;;  %v1848_v43 = vadd.f32 %v1847_v34, %v1800_v36  ;;  %v4225_v55 = vpack.c.bf16 %v1739_v39, %v1738_v13 }
 0xd81   :  { %v3449_v38 = vpop.f32.mrf.mxu0  ;;  %3464 = vmatpush3.bf16.xpose.msra.mxu1 %v1969_v37  ;;  %3465 = vmatprep.mubr.msk.bf16.mxu1 %vm3698_vm5, %v3697_v6 }
 0xd82   :  { %3475 = vmatprep.subr.bf16.mxu1 %v3697_v6 }
 0xd83   :  { %v1850_v40 = vpop.f32.mrf.mxu0 }
 0xd84   :  { %v1851_v45 = vadd.f32 %v1850_v40, %v1800_v36  ;;  %v2237_v36 = vsel %vm81_vm0, %v2232_v26, 0  ;;  %v2174_v40 = vrot.slane %v4205_v32, 4 }
 0xd85   :  { %v3450_v53 = vpop.f32.mrf.mxu0 }
 0xd86   :  { %v4227_v57 = vpack.c.bf16 %v1851_v45, %v1848_v43  ;;  %v2179_v53 = vsel %vm593_vm6, %v2174_v40, 0 }
 0xd88   :  { %3466 = vmatmul.mubr.msk.bf16.vlgmr.msra.gmra.mxu1 %vm593_vm6, %v4225_v55 }
 0xd89   :  { %3477 = vmatprep.mubr.msk.bf16.mxu1 %vm3698_vm5, %v3697_v6  ;;  %3476 = vmatpush3.bf16.msra.mxu1 %v3603_v19 }
 0xd8a   :  { %3487 = vmatprep.subr.bf16.mxu1 %v3697_v6 }
 0xe40   :  { %v1897_v63 = vpop.f32.mrf.mxu1 }
 0xe41   :  { %v1898_v56 = vadd.f32 %v1897_v63, %v3977_v52 }
 0xe42   :  { %v3455_v58 = vpop.f32.mrf.mxu1 }
 0xe43   :  { %v1903_v59 = vsel %vm640_vm7, %v1898_v56, -inf  ;;  %v2172_v58 = vrot.slane %v4214_v29, 4 }
 0xe44   :  { %1904 = vmax.xlane.f32.xlu1 %v1903_v59  ;;  %v1900_v60 = vpop.f32.mrf.mxu1  ;;  %v2283_v59 = vrot.slane %v4225_v55, 4 }
 0xe46   :  { %v3456_v61 = vpop.f32.mrf.mxu1 }
 0xe48   :  { %v2005_v2 = vpop.f32.mrf.mxu1 }
 0xe49   :  { %v2006_v3 = vadd.f32 %v2005_v2, %v3977_v52  ;;  %v2025_v52 = vsel %vm81_vm0, %v4227_v57, 0 }
 0xe4a   :  { %v3467_v4 = vpop.f32.mrf.mxu1 }
 0xe4b   :  { %v2011_v12 = vsel %vm640_vm7, %v2006_v3, -inf }
 0xe4c   :  { %2012 = vmax.xlane.f32.xlu0 %v2011_v12  ;;  %v2008_v7 = vpop.f32.mrf.mxu1 }
 0xe4e   :  { %v3468_v8 = vpop.f32.mrf.mxu1 }
 0xecd   :  { %v1905_v62 = vpop.xlane.xlu1 %1904 }
 0xece   :  { %v1906_v49 = vsub.f32 %v1898_v56, %v1905_v62  ;;  %v2285_v56 = vrot.slane %v4210_v25, 4 }
 0xed0   :  { %v1907_v9 = vmul.f32 1.442695, %v1906_v49  ;;  %v2290_v32 = vsel %vm593_vm6, %v2285_v56, 0 }
 0xed2   :  { %3642 = vpow2.f32 %v1907_v9 }
 0xed5   :  { %v2013_v11 = vpop.xlane.xlu0 %2012 }
 0xed6   :  { %v2014_v50 = vsub.f32 %v2006_v3, %v2013_v11 }
 0xed8   :  { %v2015_v10 = vmul.f32 1.442695, %v2014_v50 }
 0xeda   :  { %3644 = vpow2.f32 %v2015_v10 }
 0xedf   :  { %v3643_v14 = vpop.eup %3642 }
 0xee0   :  { %v1909_v15 = vsel %vm640_vm7, %v3643_v14, 0.0  ;;  %v1912_v17 = vpack.c.bf16 %v3643_v14, %v3643_v14 }
 0xee1   :  { %1910 = vadd.xlane.f32.xlu0 %v1909_v15 }
 0xee2   :  { %3460 = vmatmul.mubr.msk.bf16.vlgmr.msra.gmra.mxu0 %vm640_vm7, %v1912_v17 }
 0xee3   :  { %3470 = vmatpush3.bf16.msra.mxu0 %v2025_v52  ;;  %3471 = vmatprep.mubr.msk.bf16.mxu0 %vm3698_vm5, %v3697_v6 }
 0xee4   :  { %3481 = vmatprep.subr.bf16.mxu0 %v3697_v6 }
 0xee7   :  { %v3645_v46 = vpop.eup %3644 }
 0xee8   :  { %v2017_v18 = vsel %vm640_vm7, %v3645_v46, 0.0  ;;  %v2020_v44 = vpack.c.bf16 %v3645_v46, %v3645_v46 }
 0xee9   :  { %2018 = vadd.xlane.f32.xlu1 %v2017_v18 }
 0xeea   :  { %3472 = vmatmul.mubr.msk.bf16.vlgmr.msra.gmra.mxu0 %vm640_vm7, %v2020_v44 }
 0xeeb   :  { %3483 = vmatprep.mubr.msk.bf16.mxu0 %vm3698_vm5, %v3697_v6  ;;  %3482 = vmatpush3.bf16.msra.mxu0 %v4251_v48 }
 0xeec   :  { %3493 = vmatprep.subr.bf16.mxu0 %v3697_v6 }
 0xf6a   :  { %v1911_v21 = vpop.xlane.xlu0 %1910 }
 0xf6b   :  { %3646 = vrcp.f32 %v1911_v21 }
 0xf72   :  { %v2019_v47 = vpop.xlane.xlu1 %2018 }
 0xf73   :  { %3648 = vrcp.f32 %v2019_v47  ;;  %v2482_v47 = vrot.slane %v4190_v42, %v3920_v23 }
 0xf78   :  { %v3647_v22 = vpop.eup %3646 }
 0xf80   :  { %v3649_v38 = vpop.eup %3648 }
 0xfa2   :  { %v1953_v24 = vpop.f32.mrf.mxu0 }
 0xfa3   :  { %v1960_v5 = vmul.f32 %v3647_v22, %v1953_v24 }
 0xfa4   :  { %v3461_v33 = vpop.f32.mrf.mxu0 }
 0xfa5   :  { %v1961_v34 = vpack.c.bf16 %v1960_v5, %v1960_v5 }
 0xfa6   :  { %v1956_v35 = vpop.f32.mrf.mxu0 }
 0xfa7   :  { %3484 = vmatmul.mubr.msk.bf16.vlgmr.msra.gmra.mxu0 %vm593_vm6, %v1961_v34 }
 0xfa8   :  { %3494 = vmatpush3.bf16.msra.mxu0 %v2237_v36  ;;  %v3462_v37 = vpop.f32.mrf.mxu0  ;;  %3495 = vmatprep.mubr.msk.bf16.mxu0 %vm3698_vm5, %v3697_v6 }
 0xfa9   :  { %3505 = vmatprep.subr.bf16.mxu0 %v3697_v6 }
 0xfaa   :  { %v2061_v39 = vpop.f32.mrf.mxu0 }
 0xfab   :  { %v2068_v1 = vmul.f32 %v3649_v38, %v2061_v39 }
 0xfac   :  { %v3473_v13 = vpop.f32.mrf.mxu0 }
 0xfad   :  { %v2069_v43 = vpack.c.bf16 %v2068_v1, %v2068_v1 }
 0xfae   :  { %v2064_v45 = vpop.f32.mrf.mxu0 }
 0xfaf   :  { %3478 = vmatmul.mubr.msk.bf16.vlgmr.msra.gmra.mxu1 %vm593_vm6, %v2069_v43 }
 0xfb0   :  { %3488 = vmatpush3.bf16.xpose.msra.mxu1 %v2179_v53  ;;  %v3474_v63 = vpop.f32.mrf.mxu0  ;;  %3489 = vmatprep.mubr.msk.bf16.mxu1 %vm3698_vm5, %v3697_v6 }
 0xfb1   :  { %3499 = vmatprep.subr.bf16.mxu1 %v3697_v6 }
 0xfb7   :  { %3490 = vmatmul.mubr.msk.bf16.vlgmr.msra.gmra.mxu1 %vm593_vm6, %v2172_v58 }
 0xfb8   :  { %3500 = vmatpush3.bf16.xpose.msra.mxu1 %v2290_v32  ;;  %3501 = vmatprep.mubr.msk.bf16.mxu1 %vm3698_vm5, %v3697_v6 }
 0xfb9   :  { %3511 = vmatprep.subr.bf16.mxu1 %v3697_v6 }
 0xfbf   :  { %3502 = vmatmul.mubr.msk.bf16.vlgmr.msra.gmra.mxu1 %vm593_vm6, %v2283_v59 }
 0xfc0   :  { %3512 = vmatpush3.bf16.msra.mxu1 %v3603_v19  ;;  %3513 = vmatprep.mubr.msk.bf16.mxu1 %vm3698_vm5, %v3697_v6 }
 0xfc1   :  { %3523 = vmatprep.subr.bf16.mxu1 %v3697_v6 }
0x1067   :  { %v2165_v25 = vpop.f32.mrf.mxu0 }
0x1069   :  { %v3485_v29 = vpop.f32.mrf.mxu0 }
0x106b   :  { %v2168_v60 = vpop.f32.mrf.mxu0 }
0x106d   :  { %v3486_v61 = vpop.f32.mrf.mxu0 }
0x106f   :  { %v2116_v2 = vpop.f32.mrf.mxu1 }
0x1070   :  { %v2166_v3 = vadd.f32 %v2165_v25, %v2116_v2 }
0x1071   :  { %v3479_v4 = vpop.f32.mrf.mxu1 }
0x1072   :  { %v2483_v24 = vadd.f32 %v2482_v47, %v2166_v3 }
0x1073   :  { %v2119_v12 = vpop.f32.mrf.mxu1 }
0x1074   :  { %v2485_v34 = vadd.f32 %v2483_v24, %v4131_v30 }
0x1075   :  { %v3480_v7 = vpop.f32.mrf.mxu1 }
0x1076   :  { %v2487_v36 = vsel %vm163_vm4, %v2485_v34, 0.0 }
0x1077   :  { %v2215_v8 = vpop.f32.mrf.mxu1 }
0x1078   :  { %v2216_v55 = vadd.f32 %v2215_v8, %v4031_v27 }
0x1079   :  { %v3491_v62 = vpop.f32.mrf.mxu1 }
0x107a   :  { %v2221_v49 = vsel %vm640_vm7, %v2216_v55, -inf }
0x107b   :  { %2222 = vmax.xlane.f32.xlu1 %v2221_v49  ;;  %v2218_v9 = vpop.f32.mrf.mxu1 }
0x107d   :  { %v3492_v11 = vpop.f32.mrf.mxu1 }
0x107f   :  { %v2326_v50 = vpop.f32.mrf.mxu1 }
0x1080   :  { %v2327_v10 = vadd.f32 %v2326_v50, %v4031_v27  ;;  %v2343_v27 = vrot.slane %v4227_v57, 4 }
0x1081   :  { %v3503_v14 = vpop.f32.mrf.mxu1 }
0x1082   :  { %v2332_v15 = vsel %vm640_vm7, %v2327_v10, -inf  ;;  %v2348_v35 = vsel %vm81_vm0, %v2343_v27, 0 }
0x1083   :  { %2333 = vmax.xlane.f32.xlu0 %v2332_v15  ;;  %v2329_v17 = vpop.f32.mrf.mxu1 }
0x1085   :  { %v3504_v52 = vpop.f32.mrf.mxu1 }
0x1104   :  { %v2223_v46 = vpop.xlane.xlu1 %2222 }
0x1105   :  { %v2224_v18 = vsub.f32 %v2216_v55, %v2223_v46 }
0x1107   :  { %v2225_v44 = vmul.f32 1.442695, %v2224_v18 }
0x1109   :  { %3650 = vpow2.f32 %v2225_v44 }
0x110c   :  { %v2334_v19 = vpop.xlane.xlu0 %2333 }
0x110d   :  { %v2335_v21 = vsub.f32 %v2327_v10, %v2334_v19  ;;  %v3604_v19 = vld [vmem:[%s4425_s7 + $0x18] sm:$0xff]  }
0x110f   :  { %v2336_v22 = vmul.f32 1.442695, %v2335_v21 }
0x1111   :  { %3652 = vpow2.f32 %v2336_v22 }
0x1116   :  { %v3651_v26 = vpop.eup %3650 }
0x1117   :  { %v2227_v5 = vsel %vm640_vm7, %v3651_v26, 0.0  ;;  %v2230_v33 = vpack.c.bf16 %v3651_v26, %v3651_v26 }
0x1118   :  { %2228 = vadd.xlane.f32.xlu1 %v2227_v5 }
0x1119   :  { %3496 = vmatmul.mubr.msk.bf16.vlgmr.msra.gmra.mxu0 %vm640_vm7, %v2230_v33 }
0x111a   :  { %3506 = vmatpush3.bf16.msra.mxu0 %v2348_v35  ;;  %3507 = vmatprep.mubr.msk.bf16.mxu0 %vm3698_vm5, %v3697_v6 }
0x111b   :  { %3517 = vmatprep.subr.bf16.mxu0 %v3697_v6 }
0x111c   :  { %2488 = vadd.xlane.f32.xlu1 %v2487_v36 }
0x111e   :  { %v3653_v57 = vpop.eup %3652 }
0x111f   :  { %v2338_v37 = vsel %vm640_vm7, %v3653_v57, 0.0  ;;  %v2341_v38 = vpack.c.bf16 %v3653_v57, %v3653_v57 }
0x1120   :  { %2339 = vadd.xlane.f32.xlu0 %v2338_v37  ;;  %v2522_v37 = vrot.slane %v4190_v42, %v3958_v0 }
0x1121   :  { %3508 = vmatmul.mubr.msk.bf16.vlgmr.msra.gmra.mxu0 %vm640_vm7, %v2341_v38 }
0x1122   :  { %3518 = vmatpush3.bf16.msra.mxu0 %v4251_v48  ;;  %3519 = vmatprep.mubr.msk.bf16.mxu0 %vm3698_vm5, %v3697_v6 }
0x1123   :  { %3531 = vmatprep.subr.bf16.mxu0 %v3697_v6 }
0x11a1   :  { %v2229_v30 = vpop.xlane.xlu1 %2228 }
0x11a2   :  { %3654 = vrcp.f32 %v2229_v30 }
0x11a5   :  { %v2489_v39 = vpop.xlane.xlu1 %2488 }
0x11a6   :  { %v2493_v40 = vmul.f32 0.03125, %v2489_v39 }
0x11a8   :  { %v2495_v1 = vsub.f32 %v2485_v34, %v2493_v40  ;;  %v2516_v34 = vrot.slane %v4190_v42, %v3925_v28  ;;  %v3607_v42 = vld [vmem:[%s4426_s8 + $0x30] sm:$0xff]  }
0x11a9   :  { %v2340_v45 = vpop.xlane.xlu0 %2339 }
0x11aa   :  { %v2497_v13 = vmul.f32 %v2495_v1, %v2495_v1  ;;  %3656 = vrcp.f32 %v2340_v45  ;;  %v4347_v45 = vld [vmem:[%s4420_s2 + $0x18] sm:$0xff] }
0x11ac   :  { %v2499_v43 = vsel %vm163_vm4, %v2497_v13, 0.0  ;;  %v3608_v13 = vld [vmem:[%s4426_s8 + $0x28] sm:$0xff]  }
0x11ad   :  { %2500 = vadd.xlane.f32.xlu1 %v2499_v43  ;;  %v3609_v43 = vld [vmem:[%s4426_s8 + $0x20] sm:$0xff]  }
0x11af   :  { %v3655_v53 = vpop.eup %3654 }
0x11b7   :  { %v3657_v25 = vpop.eup %3656 }
0x11d9   :  { %v2273_v63 = vpop.f32.mrf.mxu0 }
0x11da   :  { %v2280_v56 = vmul.f32 %v3655_v53, %v2273_v63  ;;  %v2534_v53 = vrot.slane %v4347_v45, %v3841_v51 }
0x11db   :  { %v3497_v48 = vpop.f32.mrf.mxu0 }
0x11dc   :  { %v2281_v58 = vpack.c.bf16 %v2280_v56, %v2280_v56 }
0x11dd   :  { %v2276_v32 = vpop.f32.mrf.mxu0 }
0x11de   :  { %3520 = vmatmul.mubr.msk.bf16.vlgmr.msra.gmra.mxu0 %vm593_vm6, %v2281_v58 }
0x11df   :  { %v3498_v59 = vpop.f32.mrf.mxu0  ;;  %3539 = vmatprep.mubr.msk.bf16.mxu0 %vm3698_vm5, %v3697_v6 }
0x11e1   :  { %v2384_v29 = vpop.f32.mrf.mxu0 }
0x11e2   :  { %v2391_v60 = vmul.f32 %v3657_v25, %v2384_v29 }
0x11e3   :  { %v3509_v61 = vpop.f32.mrf.mxu0 }
0x11e4   :  { %v2392_v2 = vpack.c.bf16 %v2391_v60, %v2391_v60 }
0x11e5   :  { %v2387_v3 = vpop.f32.mrf.mxu0 }
0x11e6   :  { %3514 = vmatmul.mubr.msk.bf16.vlgmr.msra.gmra.mxu1 %vm593_vm6, %v2392_v2 }
0x11e7   :  { %v3510_v4 = vpop.f32.mrf.mxu0  ;;  %3527 = vmatprep.mubr.msk.bf16.mxu1 %vm3698_vm5, %v3697_v6  ;;  %3524 = vmatpush3.bf16.msra.mxu1 %v3604_v19 }
0x11e8   :  { %3525 = vmatprep.subr.bf16.mxu1 %v3697_v6 }
0x1236   :  { %v2501_v21 = vpop.xlane.xlu1 %2500 }
0x129e   :  { %v2473_v12 = vpop.f32.mrf.mxu0 }
0x12a0   :  { %v3521_v7 = vpop.f32.mrf.mxu0 }
0x12a2   :  { %v2476_v8 = vpop.f32.mrf.mxu0 }
0x12a4   :  { %v3522_v55 = vpop.f32.mrf.mxu0 }
0x12a6   :  { %v2430_v62 = vpop.f32.mrf.mxu1 }
0x12a7   :  { %v2474_v49 = vadd.f32 %v2473_v12, %v2430_v62 }
0x12a8   :  { %v3515_v9 = vpop.f32.mrf.mxu1 }
0x12a9   :  { %v2484_v11 = vadd.f32 %v2482_v47, %v2474_v49  ;;  %v2505_v47 = vmul.f32 0.03125, %v2501_v21 }
0x12aa   :  { %v2433_v50 = vpop.f32.mrf.mxu1 }
0x12ab   :  { %v2486_v10 = vadd.f32 %v2484_v11, %v4133_v31  ;;  %v3605_v31 = vld [vmem:[%s4425_s7 + $0x10] sm:$0xff]   ;;  %v2507_v22 = vadd.f32 1e-12, %v2505_v47 }
0x12ac   :  { %v3516_v14 = vpop.f32.mrf.mxu1  ;;  %3526 = vmatpush3.bf16.msra.mxu1 %v3605_v31 }
0x12ad   :  { %v2490_v15 = vsel %vm163_vm4, %v2486_v10, 0.0  ;;  %3543 = vmatprep.subr.mxu1 %v3697_v6  ;;  %3658 = vrsqrt.f32 %v2507_v22 }
0x12ae   :  { %2491 = vadd.xlane.f32.xlu0 %v2490_v15 }
0x12ba   :  { %v3659_v5 = vpop.eup %3658 }
0x12bb   :  { %v2511_v33 = vmul.f32 %v3659_v5, %v2495_v1  ;;  %v3606_v1 = vld [vmem:[%s4426_s8 + $0x38] sm:$0xff]  }
0x12bc   :  { %3532 = vmatpush3.bf16.msra.mxu0 %v3606_v1  ;;  %v2731_v1 = vld [vmem:[%s4427_s9] sm:$0xff] }
0x12bd   :  { %v2517_v57 = vmul.f32 %v2516_v34, %v2511_v33  ;;  %3533 = vmatprep.subr.bf16.mxu0 %v3697_v6 }
0x12bf   :  { %v2523_v30 = vadd.f32 %v2522_v37, %v2517_v57 }
0x12c0   :  { %3534 = vmatpush3.bf16.msra.mxu0 %v3607_v42 }
0x12c1   :  { %3535 = vmatprep.subr.bf16.mxu0 %v3697_v6 }
0x12c4   :  { %3536 = vmatpush3.bf16.msra.mxu0 %v3608_v13 }
0x12c5   :  { %3537 = vmatprep.subr.bf16.mxu0 %v3697_v6 }
0x12c8   :  { %3538 = vmatpush3.bf16.msra.mxu0 %v3609_v43 }
0x1337   :  { %v2492_v17 = vpop.xlane.xlu0 %2491 }
0x1338   :  { %v2494_v52 = vmul.f32 0.03125, %v2492_v17  ;;  %v2622_v17 = vrot.slane %v4347_v45, %v3849_v54 }
0x133a   :  { %v2496_v46 = vsub.f32 %v2486_v10, %v2494_v52 }
0x133c   :  { %v2498_v18 = vmul.f32 %v2496_v46, %v2496_v46 }
0x133e   :  { %v2502_v44 = vsel %vm163_vm4, %v2498_v18, 0.0 }
0x133f   :  { %2503 = vadd.xlane.f32.xlu0 %v2502_v44 }
0x13c8   :  { %v2504_v24 = vpop.xlane.xlu0 %2503 }
0x13c9   :  { %v2506_v27 = vmul.f32 0.03125, %v2504_v24 }
0x13cb   :  { %v2508_v26 = vadd.f32 1e-12, %v2506_v27 }
0x13cd   :  { %3660 = vrsqrt.f32 %v2508_v26 }
0x13da   :  { %v3661_v35 = vpop.eup %3660 }
0x13db   :  { %v2512_v36 = vmul.f32 %v3661_v35, %v2496_v46 }
0x13dd   :  { %v2518_v38 = vmul.f32 %v2516_v34, %v2512_v36 }
0x13df   :  { %v2524_v39 = vadd.f32 %v2522_v37, %v2518_v38 }
0x13e1   :  { %v2525_v40 = vpack.c.bf16 %v2524_v39, %v2523_v30 }
0x13e3   :  { %3528 = vmatmul.mubr.msk.bf16.vlgmr.msra.gmra.mxu1 %vm163_vm4, %v2525_v40  ;;  %v2732_v40 = vld [vmem:[%s4427_s9 + $0x8] sm:$0xff] }
0x13e4   :  { %3551 = vmatprep.mubr.msk.f32.mxu1 %vm3698_vm5, %v3697_v6 }
0x14a3   :  { %v2584_v63 = vpop.f32.mrf.mxu1 }
0x14a4   :  { %v2585_v56 = vadd.f32 %v2584_v63, %v2534_v53 }
0x14a5   :  { %v3529_v48 = vpop.f32.mrf.mxu1 }
0x14a6   :  { %v2591_v58 = vmul.f32 %v2585_v56, %v2585_v56 }
0x14a7   :  { %v2587_v32 = vpop.f32.mrf.mxu1 }
0x14a8   :  { %v2593_v59 = vmul.f32 %v2591_v58, %v2585_v56  ;;  %v2588_v25 = vadd.f32 %v2587_v32, %v2534_v53  ;;  %v2722_v32 = vrot.slane %v4347_v45, %v3915_v20 }
0x14a9   :  { %v3530_v29 = vpop.f32.mrf.mxu1 }
0x14aa   :  { %v2595_v60 = vmul.f32 0.044715, %v2593_v59  ;;  %v2592_v61 = vmul.f32 %v2588_v25, %v2588_v25 }
0x14ac   :  { %v2597_v2 = vadd.f32 %v2595_v60, %v2585_v56  ;;  %v2594_v3 = vmul.f32 %v2592_v61, %v2588_v25  ;;  %v2728_v61 = vrot.slane %v4347_v45, %v3936_v41 }
0x14ae   :  { %v2599_v4 = vmul.f32 0.7978846, %v2597_v2  ;;  %v2596_v12 = vmul.f32 0.044715, %v2594_v3 }
0x14b0   :  { %3662 = vtanh.f32 %v2599_v4  ;;  %v2598_v7 = vadd.f32 %v2596_v12, %v2588_v25 }
0x14b2   :  { %v2600_v8 = vmul.f32 0.7978846, %v2598_v7  ;;  %v2842_v7 = vld [vmem:[%s4428_s10 + $0x18] sm:$0xff] }
0x14b4   :  { %3664 = vtanh.f32 %v2600_v8  ;;  %v2841_v8 = vld [vmem:[%s4428_s10 + $0x10] sm:$0xff] }
0x14bd   :  { %v3663_v55 = vpop.eup %3662 }
0x14be   :  { %v2603_v62 = vadd.f32 1.0, %v3663_v55  ;;  %v2840_v55 = vld [vmem:[%s4428_s10 + $0x8] sm:$0xff] }
0x14c0   :  { %v2605_v9 = vmul.f32 0.5, %v2603_v62  ;;  %v2839_v62 = vld [vmem:[%s4428_s10] sm:$0xff] }
0x14c1   :  { %v3665_v49 = vpop.eup %3664 }
0x14c2   :  { %v2604_v11 = vadd.f32 1.0, %v3665_v49  ;;  %v2607_v10 = vmul.f32 %v2605_v9, %v2585_v56  ;;  %v44_v49 = vld [vmem:[%s4420_s2 + $0x20] sm:$0xff]  ;;  %s3699_s2 = smov [#allocation2]  }
0x14c3   :  { %v2821_v9 = vadd.f32 1e-05, %v44_v49  ;;  %s2952_s10 = sshll.u32 %s3699_s2, 4  ;;  %s2953_s10 = int_to_ptr.vmem [resolvable:$true] %s2952_s10 }
0x14c4   :  { %v2606_v50 = vmul.f32 0.5, %v2604_v11  ;;  %v2738_v11 = vrot.slane %v4347_v45, %v3912_v16  ;;  %s3674_s7 = scalar_lea.vmem %s2953_s10, 32  ;;  %p3679_p1 = scmp.lt.s32.totalorder %s2953_s10, %s2953_s10 }
0x14c5   :  { %p3675_p0 = scmp.ne.s32.totalorder %s2953_s10, %s3674_s7  ;;  %p3680_p2 = scmp.lt.s32.totalorder %s3674_s7, %s3674_s7 }
0x14c6   :  { %v2608_v14 = vmul.f32 %v2606_v50, %v2588_v25 }
0x14c7   :  { %p3681_p3 = por %p3680_p2, %p3679_p1 }
0x14c8   :  { %v2609_v15 = vpack.c.bf16 %v2608_v14, %v2607_v10  ;;  %v2819_v10 = vrot.slane %v4347_v45, %v3958_v0  ;;  %v2846_v0 = vrot.slane %v44_v49, %v3849_v54  ;;  %v2938_v54 = vrot.slane %v44_v49, %v3915_v20 }
0x14c9   :  { %p3682_p4 = pnand %p3681_p3, %p3675_p0 }
0x14ca   :  { %3540 = vmatmul.mubr.msk.bf16.vlgmr.msra.gmra.mxu0 %vm1386_vm8, %v2609_v15 }
0x158a   :  { %v2684_v52 = vpop.f32.mrf.mxu0 }
0x158b   :  { %v2685_v46 = vadd.f32 %v2684_v52, %v2622_v17 }
0x158c   :  { %v3541_v18 = vpop.f32.mrf.mxu0 }
0x158d   :  { %v2691_v44 = vadd.f32 %v2685_v46, %v2523_v30  ;;  %v2734_v30 = vld [vmem:[%s4427_s9 + $0x18] sm:$0xff]  ;;  %v2831_v46 = vrot.slane %v4347_v45, %v3920_v23 }
0x158e   :  { %v2687_v19 = vpop.f32.mrf.mxu0  ;;  %3544 = vmatpush3.msra.mxu1 %v2734_v30 }
0x158f   :  { %v2688_v31 = vadd.f32 %v2687_v19, %v2622_v17  ;;  %v2693_v21 = vsel %vm163_vm4, %v2691_v44, 0.0  ;;  %3545 = vmatprep.subr.mxu1 %v3697_v6 }
0x1590   :  { %2694 = vadd.xlane.f32.xlu0 %v2693_v21  ;;  %v3542_v47 = vpop.f32.mrf.mxu0 }
0x1591   :  { %v2692_v22 = vadd.f32 %v2688_v31, %v2524_v39  ;;  %v2733_v39 = vld [vmem:[%s4427_s9 + $0x10] sm:$0xff] }
0x1592   :  { %3546 = vmatpush3.msra.mxu1 %v2733_v39 }
0x1593   :  { %v2696_v24 = vsel %vm163_vm4, %v2692_v22, 0.0  ;;  %3547 = vmatprep.subr.mxu1 %v3697_v6 }
0x1594   :  { %2697 = vadd.xlane.f32.xlu1 %v2696_v24  ;;  %3548 = vmatpush3.msra.mxu1 %v2732_v40 }
0x1595   :  { %3549 = vmatprep.subr.mxu1 %v3697_v6 }
0x1596   :  { %3550 = vmatpush3.msra.mxu1 %v2731_v1 }
0x1597   :  { %3554 = vmatprep.subr.mxu1 %v3697_v6 }
0x1619   :  { %v2695_v27 = vpop.xlane.xlu0 %2694 }
0x161a   :  { %v2699_v26 = vmul.f32 0.03125, %v2695_v27 }
0x161c   :  { %v2701_v5 = vsub.f32 %v2691_v44, %v2699_v26  ;;  %v2836_v44 = vrot.slane %v4347_v45, %v3925_v28 }
0x161d   :  { %v2698_v33 = vpop.xlane.xlu1 %2697 }
0x161e   :  { %v2700_v34 = vmul.f32 0.03125, %v2698_v33  ;;  %v2703_v35 = vmul.f32 %v2701_v5, %v2701_v5 }
0x1620   :  { %v2702_v36 = vsub.f32 %v2692_v22, %v2700_v34  ;;  %v2705_v57 = vsel %vm163_vm4, %v2703_v35, 0.0 }
0x1621   :  { %2706 = vadd.xlane.f32.xlu0 %v2705_v57 }
0x1622   :  { %v2704_v37 = vmul.f32 %v2702_v36, %v2702_v36 }
0x1624   :  { %v2708_v38 = vsel %vm163_vm4, %v2704_v37, 0.0 }
0x1625   :  { %2709 = vadd.xlane.f32.xlu1 %v2708_v38 }
0x16aa   :  { %v2707_v42 = vpop.xlane.xlu0 %2706 }
0x16ab   :  { %v2711_v13 = vmul.f32 0.03125, %v2707_v42 }
0x16ad   :  { %v2713_v43 = vadd.f32 1e-12, %v2711_v13 }
0x16ae   :  { %v2710_v53 = vpop.xlane.xlu1 %2709 }
0x16af   :  { %3666 = vrsqrt.f32 %v2713_v43  ;;  %v2712_v63 = vmul.f32 0.03125, %v2710_v53 }
0x16b1   :  { %v2714_v56 = vadd.f32 1e-12, %v2712_v63 }
0x16b3   :  { %3668 = vrsqrt.f32 %v2714_v56 }
0x16b4   :  { %3670 = vrsqrt.f32 %v2821_v9 }
0x16bc   :  { %v3667_v48 = vpop.eup %3666 }
0x16bd   :  { %v2717_v58 = vmul.f32 %v3667_v48, %v2701_v5 }
0x16bf   :  { %v2723_v29 = vmul.f32 %v2722_v32, %v2717_v58 }
0x16c0   :  { %v3669_v59 = vpop.eup %3668 }
0x16c1   :  { %v2718_v25 = vmul.f32 %v3669_v59, %v2702_v36  ;;  %v2729_v3 = vadd.f32 %v2728_v61, %v2723_v29  ;;  %v3671_v50 = vpop.eup %3670  ;;  %v2943_v36 = vrot.slane %v44_v49, %v3936_v41 }
0x16c2   :  { %v2826_v17 = vrot.slane %v3671_v50, %v3841_v51 }
0x16c3   :  { %v2724_v60 = vmul.f32 %v2722_v32, %v2718_v25 }
0x16c5   :  { %v2730_v2 = vadd.f32 %v2728_v61, %v2724_v60 }
0x16c7   :  { %v2741_v4 = vrot.slane %v2730_v2, 7 }
0x16c9   :  { %v2743_v12 = vsel %vm2742_vm9, %v2741_v4, %v2729_v3 }
0x16ca   :  { %3552 = vmatmul.mubr.msk.f32.vlgmr.msra.gmra.mxu1 %vm163_vm4, %v2743_v12 }
0x16cb   :  { %3562 = vmatprep.mubr.msk.f32.mxu1 %vm3698_vm5, %v3697_v6  ;;  %3555 = vmatpush3.msra.mxu1 %v2842_v7 }
0x16cc   :  { %3556 = vmatprep.subr.mxu1 %v3697_v6 }
0x16cd   :  { %3557 = vmatpush3.msra.mxu1 %v2841_v8 }
0x16ce   :  { %3558 = vmatprep.subr.mxu1 %v3697_v6 }
0x16cf   :  { %3559 = vmatpush3.msra.mxu1 %v2840_v55 }
0x16d0   :  { %3560 = vmatprep.subr.mxu1 %v3697_v6 }
0x16d1   :  { %3561 = vmatpush3.msra.mxu1 %v2839_v62 }
0x178a   :  { %v2812_v14 = vpop.f32.mrf.mxu1 }
0x178b   :  { %v2813_v15 = vadd.f32 %v2812_v14, %v2738_v11 }
0x178c   :  { %v3553_v52 = vpop.f32.mrf.mxu1 }
0x178d   :  { %v2820_v6 = vsub.f32 %v2813_v15, %v2819_v10 }
0x178f   :  { %v2827_v18 = vmul.f32 %v2826_v17, %v2820_v6 }
0x1791   :  { %v2832_v19 = vmul.f32 %v2831_v46, %v2827_v18 }
0x1793   :  { %v2837_v31 = vadd.f32 %v2836_v44, %v2832_v19 }
0x1795   :  { %v2838_v16 = vmax.f32 %v2837_v31, 0.0 }
0x1797   :  { %3563 = vmatmul.mubr.msk.f32.vlgmr.msra.gmra.mxu1 %vm163_vm4, %v2838_v16 }
0x1857   :  { %v2916_v21 = vpop.f32.mrf.mxu1 }
0x1858   :  { %v2917_v47 = vadd.f32 %v2916_v21, %v2846_v0 }
0x1859   :  { %v3564_v51 = vpop.f32.mrf.mxu1 }
0x185a   :  { %v2921_v22 = vsel %vm2920_vm10, %v2917_v47, 0.0 }
0x185b   :  { %2922 = vadd.xlane.f32.xlu1 %v2921_v22 }
0x18e4   :  { %v2923_v24 = vpop.xlane.xlu1 %2922 }
0x18e5   :  { %v2925_v23 = vmul.f32 0.0625, %v2923_v24 }
0x18e7   :  { %v2926_v27 = vsub.f32 %v2917_v47, %v2925_v23 }
0x18e9   :  { %v2927_v26 = vmul.f32 %v2926_v27, %v2926_v27 }
0x18eb   :  { %v2928_v28 = vsel %vm2920_vm10, %v2927_v26, 0.0 }
0x18ec   :  { %2929 = vadd.xlane.f32.xlu0 %v2928_v28 }
0x1975   :  { %v2930_v45 = vpop.xlane.xlu0 %2929 }
0x1976   :  { %v2931_v5 = vmul.f32 0.0625, %v2930_v45 }
0x1978   :  { %v2932_v33 = vadd.f32 1e-05, %v2931_v5 }
0x197a   :  { %3672 = vrsqrt.f32 %v2932_v33 }
0x1987   :  { %v3673_v34 = vpop.eup %3672 }
0x1988   :  { %v2934_v35 = vmul.f32 %v3673_v34, %v2926_v27 }
0x198a   :  { %v2939_v57 = vmul.f32 %v2938_v54, %v2934_v35 }
0x198c   :  { %v2944_v37 = vadd.f32 %v2943_v36, %v2939_v57 }
0x198e   :  { %2945 = vst.msk [vmem:[#allocation2] sm:$0x3] %vm2920_vm10, %v2944_v37 }
0x198f   :  { %3685 = shalt.err (!%p3682_p4)
}
0x1990   :  { %2955 = dma.vmem_to_hbm [thread:$0]  %s2953_s10, 32, %s4429_s11, [#allocation3]  }
0x1991   :  { %3694 = dma.done.wait [#allocation3], 32  }
0x1992   :  { %3695 = vsyncadd [#allocation3], 4294967264 }
0x1993   :  { %2959 = vsyncpa [#allocation3], 1 }

</bundles_post_ra>
